<compile_context>
chip_gen: v7x
topology: tpu7x:2x2x1
jax: 0.10.0
libtpu: 0.0.40
codegen_flags: <defaults>
</compile_context>

<pallas_src>
import functools

import jax
import jax.numpy as jnp
from jax import lax
from jax.experimental import pallas as pl
from jax.experimental.pallas import tpu as pltpu


# ----------------------------------------------------------------------------
# small helpers
# ----------------------------------------------------------------------------
def _round_up(n, m):
    return ((n + m - 1) // m) * m


def _cdiv(a, b):
    return (a + b - 1) // b


def _pad_gate_matrix(w_t, h, hp, rows_pad, dtype):
    """(rows, 4*h) gate matrix (torch-transposed layout, gates i|f|g|o) ->
    (rows_pad, 4*hp) with gate g occupying lanes [g*hp, g*hp + h); rest zero."""
    rows = w_t.shape[0]
    w4 = w_t.reshape(rows, 4, h).astype(dtype)
    out = jnp.zeros((rows_pad, 4, hp), dtype).at[:rows, :, :h].set(w4)
    return out.reshape(rows_pad, 4 * hp)


def _pad_gate_bias(b, h, hp):
    b4 = b.reshape(4, h).astype(jnp.float32)
    out = jnp.zeros((4, hp), jnp.float32).at[:, :h].set(b4)
    return out.reshape(1, 4 * hp)


def _lstm_cell_update(gates, c, hp):
    """Gate math in f32 on lane-aligned 128-wide gate slots."""
    i_g = jax.nn.sigmoid(gates[:, 0 * hp:1 * hp])
    f_g = jax.nn.sigmoid(gates[:, 1 * hp:2 * hp])
    g_g = jnp.tanh(gates[:, 2 * hp:3 * hp])
    o_g = jax.nn.sigmoid(gates[:, 3 * hp:4 * hp])
    c_new = f_g * c + i_g * g_g
    h_new = o_g * jnp.tanh(c_new)
    return h_new, c_new


# ----------------------------------------------------------------------------
# fused Pallas kernel: layer-1 LSTM -> reshape -> layer-2 LSTM -> FC
#   grid axis = brick groups (sequential, layer-2 state carried in scratch)
# ----------------------------------------------------------------------------
def _fused_srnn_kernel(x_ref, wih1_ref, whh1_ref, b1_ref,
                       wih2_ref, whh2_ref, b2_ref,
                       wfc_ref, bfc_ref,
                       out_ref,
                       xp1_ref, xp2_ref, h2_ref, c2_ref,
                       *, k, nb, nbt, bp, hp0, hp1, mask_tail):
    g = pl.program_id(0)
    rows = nbt * bp  # padded (bricks-in-group * batch) row count

    @pl.when(g == 0)
    def _init():
        h2_ref[...] = jnp.zeros_like(h2_ref)
        c2_ref[...] = jnp.zeros_like(c2_ref)

    # ---- layer-1 input projection, hoisted off the serial recurrence ----
    wih1 = wih1_ref[...]
    b1 = b1_ref[...]
    for t in range(k):                     # static; one MXU matmul per in-brick step
        xp1_ref[t] = jnp.dot(x_ref[t], wih1,
                             preferred_element_type=jnp.float32) + b1

    # ---- layer-1 LSTM recurrence over the k in-brick timesteps ----
    whh1 = whh1_ref[...]

    def l1_step(t, carry):
        h, c = carry
        gates = xp1_ref[t] + jnp.dot(h.astype(whh1.dtype), whh1,
                                     preferred_element_type=jnp.float32)
        return _lstm_cell_update(gates, c, hp0)

    zeros1 = jnp.zeros((rows, hp0), jnp.float32)
    h1, _ = lax.fori_loop(0, k, l1_step, (zeros1, zeros1), unroll=True)

    # ---- layer-2 input projection for this group's brick outputs (stays in VMEM) ----
    xp2_ref[...] = jnp.dot(h1.astype(wih2_ref.dtype), wih2_ref[...],
                           preferred_element_type=jnp.float32) + b2_ref[...]

    # ---- layer-2 LSTM recurrence over the bricks in this group ----
    whh2 = whh2_ref[...]

    def l2_step(i, carry):
        h, c = carry
        r0 = pl.multiple_of(i * bp, 8)
        gates = xp2_ref[pl.ds(r0, bp), :] + jnp.dot(
            h.astype(whh2.dtype), whh2, preferred_element_type=jnp.float32)
        h_new, c_new = _lstm_cell_update(gates, c, hp1)
        if mask_tail:  # static flag: only when the last group has padded bricks
            valid = (g * nbt + i) < nb
            h_new = jnp.where(valid, h_new, h)
            c_new = jnp.where(valid, c_new, c)
        return h_new, c_new

    h2, c2 = lax.fori_loop(0, nbt, l2_step, (h2_ref[...], c2_ref[...]),
                           unroll=True)
    h2_ref[...] = h2
    c2_ref[...] = c2

    # ---- final FC on the last grid step (lane-dense padded output tile) ----
    @pl.when(g == pl.num_programs(0) - 1)
    def _fc():
        out_ref[...] = (jnp.dot(h2.astype(wfc_ref.dtype), wfc_ref[...],
                                preferred_element_type=jnp.float32)
                        + bfc_ref[...]).astype(out_ref.dtype)


# ----------------------------------------------------------------------------
# wrapper: packing / padding + pallas_call plumbing
# ----------------------------------------------------------------------------
def shallow_rnn_forward(params, x, k, *, mm_dtype=jnp.bfloat16):
    """ShallowRNN forward. x: [seq_len, batch, input_dim]; returns [batch, output_dim]."""
    T, B, D = x.shape
    nb = T // k
    assert nb >= 1, "sequence shorter than one brick"
    total = nb * k  # trailing T % k timesteps dropped (matches the torch module)

    H0 = params["w_hh1_t"].shape[0]
    H1 = params["w_hh2_t"].shape[0]
    O = params["w_fc_t"].shape[1]
    hp0 = _round_up(H0, 128)
    hp1 = _round_up(H1, 128)
    op = _round_up(O, 128)
    bp = _round_up(B, 8)

    # brick-group tiling: each grid step handles nbt bricks (~256 padded rows)
    nbt = max(1, min(nb, 256 // bp))
    num_groups = _cdiv(nb, nbt)
    nb_pad = num_groups * nbt
    rows = nbt * bp

    # ---- pack / pad params: lane-aligned gate slots, zero-padded rows, bf16 ----
    wih1 = _pad_gate_matrix(params["w_ih1_t"], H0, hp0, rows_pad=D, dtype=mm_dtype)
    whh1 = _pad_gate_matrix(params["w_hh1_t"], H0, hp0, rows_pad=hp0, dtype=mm_dtype)
    b1 = _pad_gate_bias(params["b1"], H0, hp0)
    wih2 = _pad_gate_matrix(params["w_ih2_t"], H1, hp1, rows_pad=hp0, dtype=mm_dtype)
    whh2 = _pad_gate_matrix(params["w_hh2_t"], H1, hp1, rows_pad=hp1, dtype=mm_dtype)
    b2 = _pad_gate_bias(params["b2"], H1, hp1)
    wfc = jnp.zeros((hp1, op), mm_dtype).at[:H1, :O].set(
        params["w_fc_t"].astype(mm_dtype))
    bfc = jnp.zeros((1, op), jnp.float32).at[0, :O].set(params["b_fc"])

    # ---- input packing: the module's split_by_bricks + permute + reshape is a pure
    # reshape of x:  time index t = j*nb + i  ->  (in-brick step j, brick i).
    # Pad batch to bp sublanes and bricks to nb_pad so the grid tiles evenly.
    xb = jnp.zeros((k, nb_pad, bp, D), mm_dtype).at[:, :nb, :B, :].set(
        x[:total].astype(mm_dtype).reshape(k, nb, B, D))
    xb = xb.reshape(k, nb_pad * bp, D)

    # advisory cost estimate for XLA scheduling
    flops = 2 * (k * nb_pad * bp * D * 4 * hp0        # layer-1 input projection
                 + k * nb_pad * bp * hp0 * 4 * hp0    # layer-1 recurrence
                 + nb_pad * bp * hp0 * 4 * hp1        # layer-2 input projection
                 + nb_pad * bp * hp1 * 4 * hp1        # layer-2 recurrence
                 + bp * hp1 * op)                     # fc
    transcendentals = 5 * (k * nb_pad * bp * hp0 + nb_pad * bp * hp1)
    bytes_accessed = sum(int(a.size) * a.dtype.itemsize
                         for a in (xb, wih1, whh1, b1, wih2, whh2, b2, wfc, bfc))
    bytes_accessed += bp * op * 4

    kernel = functools.partial(
        _fused_srnn_kernel, k=k, nb=nb, nbt=nbt, bp=bp, hp0=hp0, hp1=hp1,
        mask_tail=(nb_pad != nb))

    out_p = pl.pallas_call(
        kernel,
        out_shape=jax.ShapeDtypeStruct((bp, op), jnp.float32),
        grid_spec=pltpu.PrefetchScalarGridSpec(
            num_scalar_prefetch=0,
            grid=(num_groups,),
            in_specs=[
                pl.BlockSpec((k, rows, D), lambda g: (0, g, 0)),    # x (brick group)
                pl.BlockSpec((D, 4 * hp0), lambda g: (0, 0)),       # W_ih1
                pl.BlockSpec((hp0, 4 * hp0), lambda g: (0, 0)),     # W_hh1
                pl.BlockSpec((1, 4 * hp0), lambda g: (0, 0)),       # b1
                pl.BlockSpec((hp0, 4 * hp1), lambda g: (0, 0)),     # W_ih2
                pl.BlockSpec((hp1, 4 * hp1), lambda g: (0, 0)),     # W_hh2
                pl.BlockSpec((1, 4 * hp1), lambda g: (0, 0)),       # b2
                pl.BlockSpec((hp1, op), lambda g: (0, 0)),          # W_fc
                pl.BlockSpec((1, op), lambda g: (0, 0)),            # b_fc
            ],
            out_specs=pl.BlockSpec((bp, op), lambda g: (0, 0)),
            scratch_shapes=[
                pltpu.VMEM((k, rows, 4 * hp0), jnp.float32),        # layer-1 x-proj
                pltpu.VMEM((rows, 4 * hp1), jnp.float32),           # layer-2 x-proj
                pltpu.VMEM((bp, hp1), jnp.float32),                 # layer-2 h state
                pltpu.VMEM((bp, hp1), jnp.float32),                 # layer-2 c state
            ],
        ),
        compiler_params=pltpu.CompilerParams(
            dimension_semantics=("arbitrary",)),
        cost_estimate=pl.CostEstimate(
            flops=flops, transcendentals=transcendentals,
            bytes_accessed=bytes_accessed),
    )(xb, wih1, whh1, b1, wih2, whh2, b2, wfc, bfc)

    return out_p[:B, :O]


# ----------------------------------------------------------------------------
# pure-JAX f32 reference (for a sanity check)
# ----------------------------------------------------------------------------
def split_by_bricks(sequence, brick_size):
    T, B, D = sequence.shape
    num_bricks = T // brick_size
    total_len = brick_size * num_bricks
    s = sequence[:total_len].reshape(brick_size, num_bricks, B, D)
    return jnp.transpose(s, (1, 0, 2, 3))


def _lstm_ref(x, w_ih_t, w_hh_t, bias):
    T, B, D = x.shape
    H = w_hh_t.shape[0]

    def step(carry, x_t):
        h, c = carry
        gates = x_t @ w_ih_t + h @ w_hh_t + bias
        i = jax.nn.sigmoid(gates[:, 0 * H:1 * H])
        f = jax.nn.sigmoid(gates[:, 1 * H:2 * H])
        g = jnp.tanh(gates[:, 2 * H:3 * H])
        o = jax.nn.sigmoid(gates[:, 3 * H:4 * H])
        c = f * c + i * g
        h = o * jnp.tanh(c)
        return (h, c), None

    (h, _), _ = lax.scan(step, (jnp.zeros((B, H)), jnp.zeros((B, H))), x)
    return h


def shallow_rnn_ref(params, x, k):
    bricks = split_by_bricks(x, k)
    nb, bs, B, D = bricks.shape
    bricks = jnp.transpose(bricks, (1, 0, 2, 3)).reshape(k, nb * B, D)
    first = _lstm_ref(bricks, params["w_ih1_t"], params["w_hh1_t"], params["b1"])
    first = first.reshape(nb, B, -1)
    second = _lstm_ref(first, params["w_ih2_t"], params["w_hh2_t"], params["b2"])
    return second @ params["w_fc_t"] + params["b_fc"]


# ----------------------------------------------------------------------------
# parameter construction (deterministic, PyTorch-style uniform init)
# ----------------------------------------------------------------------------
def init_params(key, input_dim, hidden_dims, output_dim):
    h0, h1 = hidden_dims
    ks = jax.random.split(key, 10)

    def unif(k_, shape, fan):
        bound = 1.0 / jnp.sqrt(fan)
        return jax.random.uniform(k_, shape, jnp.float32, -bound, bound)

    # torch.nn.LSTM stores weight_ih [4H, D]; we pre-transpose to [D, 4H].
    w_ih1 = unif(ks[0], (4 * h0, input_dim), h0)
    w_hh1 = unif(ks[1], (4 * h0, h0), h0)
    b1 = unif(ks[2], (4 * h0,), h0) + unif(ks[3], (4 * h0,), h0)  # b_ih + b_hh

    w_ih2 = unif(ks[4], (4 * h1, h0), h1)
    w_hh2 = unif(ks[5], (4 * h1, h1), h1)
    b2 = unif(ks[6], (4 * h1,), h1) + unif(ks[7], (4 * h1,), h1)

    w_fc = unif(ks[8], (output_dim, h1), h1)
    b_fc = unif(ks[9], (output_dim,), h1)

    return dict(
        w_ih1_t=w_ih1.T, w_hh1_t=w_hh1.T, b1=b1,
        w_ih2_t=w_ih2.T, w_hh2_t=w_hh2.T, b2=b2,
        w_fc_t=w_fc.T, b_fc=b_fc,
    )


if __name__ == "__main__":
    # Small shapes consistent with the module's forward.
    seq_len, batch, input_dim = 8, 2, 16
    hidden_dims = [32, 32]
    output_dim = 8
    k = 4  # brick size -> num_bricks = 2

    key = jax.random.PRNGKey(0)
    pkey, xkey = jax.random.split(key)
    params = init_params(pkey, input_dim, hidden_dims, output_dim)
    x = jax.random.normal(xkey, (seq_len, batch, input_dim), jnp.float32)

    fwd = jax.jit(functools.partial(shallow_rnn_forward, params, k=k))
    out = fwd(x)
    jax.block_until_ready(out)

    assert out.shape == (batch, output_dim), out.shape

    ref = shallow_rnn_ref(params, x, k)
    assert jnp.allclose(out, ref, rtol=5e-2, atol=5e-2), (out, ref)

    print("KERNEL_OK")
</pallas_src>

<mosaic_0001>
module attributes {stable_mosaic.version = 11 : i64} {
  func.func @_fused_srnn_kernel(%arg0: i32, %arg1: memref<4x16x16xbf16, #tpu.memory_space<vmem>>, %arg2: memref<16x512xbf16, #tpu.memory_space<vmem>>, %arg3: memref<128x512xbf16, #tpu.memory_space<vmem>>, %arg4: memref<1x512xf32, #tpu.memory_space<vmem>>, %arg5: memref<128x512xbf16, #tpu.memory_space<vmem>>, %arg6: memref<128x512xbf16, #tpu.memory_space<vmem>>, %arg7: memref<1x512xf32, #tpu.memory_space<vmem>>, %arg8: memref<128x128xbf16, #tpu.memory_space<vmem>>, %arg9: memref<1x128xf32, #tpu.memory_space<vmem>>, %arg10: memref<8x128xf32, #tpu.memory_space<vmem>>, %arg11: memref<4x16x512xf32, #tpu.memory_space<vmem>>, %arg12: memref<16x512xf32, #tpu.memory_space<vmem>>, %arg13: memref<8x128xf32, #tpu.memory_space<vmem>>, %arg14: memref<8x128xf32, #tpu.memory_space<vmem>>) attributes {dimension_semantics = [#tpu.dimension_semantics<arbitrary>], iteration_bounds = array<i64: 1>, scalar_prefetch = 0 : i64, scratch_operands = 4 : i64, tpu.core_type = #tpu.core_type<tc>, window_params = [{transform_indices = @transform_0, window_bounds = array<i64: 4, 16, 16>}, {pipeline_mode = #tpu.pipeline_mode<synchronous>, transform_indices = @transform_1, window_bounds = array<i64: 16, 512>}, {pipeline_mode = #tpu.pipeline_mode<synchronous>, transform_indices = @transform_2, window_bounds = array<i64: 128, 512>}, {pipeline_mode = #tpu.pipeline_mode<synchronous>, transform_indices = @transform_3, window_bounds = array<i64: 1, 512>}, {pipeline_mode = #tpu.pipeline_mode<synchronous>, transform_indices = @transform_4, window_bounds = array<i64: 128, 512>}, {pipeline_mode = #tpu.pipeline_mode<synchronous>, transform_indices = @transform_5, window_bounds = array<i64: 128, 512>}, {pipeline_mode = #tpu.pipeline_mode<synchronous>, transform_indices = @transform_6, window_bounds = array<i64: 1, 512>}, {pipeline_mode = #tpu.pipeline_mode<synchronous>, transform_indices = @transform_7, window_bounds = array<i64: 128, 128>}, {pipeline_mode = #tpu.pipeline_mode<synchronous>, transform_indices = @transform_8, window_bounds = array<i64: 1, 128>}, {pipeline_mode = #tpu.pipeline_mode<synchronous>, transform_indices = @transform_9, window_bounds = array<i64: 8, 128>}]} {
    %c0_i32 = arith.constant 0 : i32
    %0 = arith.cmpi eq, %arg0, %c0_i32 : i32
    %1 = arith.extui %0 : i1 to i32
    %c0_i32_0 = arith.constant 0 : i32
    %2 = arith.cmpi ne, %1, %c0_i32_0 : i32
    scf.if %2 {
      %cst_89 = arith.constant 0.000000e+00 : f32
      %242 = vector.broadcast %cst_89 : f32 to vector<8x128xf32>
      %c0_90 = arith.constant 0 : index
      %c0_91 = arith.constant 0 : index
      %243 = vector.load %arg13[%c0_90, %c0_91] : memref<8x128xf32, #tpu.memory_space<vmem>>, vector<8x128xf32>
      tpu.vector_store %arg13[%c0_90, %c0_91], %242 {strides = array<i32>} : memref<8x128xf32, #tpu.memory_space<vmem>>, vector<8x128xf32>,
      %cst_92 = arith.constant 0.000000e+00 : f32
      %244 = vector.broadcast %cst_92 : f32 to vector<8x128xf32>
      %c0_93 = arith.constant 0 : index
      %c0_94 = arith.constant 0 : index
      %245 = vector.load %arg14[%c0_93, %c0_94] : memref<8x128xf32, #tpu.memory_space<vmem>>, vector<8x128xf32>
      tpu.vector_store %arg14[%c0_93, %c0_94], %244 {strides = array<i32>} : memref<8x128xf32, #tpu.memory_space<vmem>>, vector<8x128xf32>,
    } else {
    }
    %c0 = arith.constant 0 : index
    %c0_1 = arith.constant 0 : index
    %3 = vector.load %arg2[%c0, %c0_1] : memref<16x512xbf16, #tpu.memory_space<vmem>>, vector<16x512xbf16>
    %c0_2 = arith.constant 0 : index
    %c0_3 = arith.constant 0 : index
    %4 = vector.load %arg4[%c0_2, %c0_3] : memref<1x512xf32, #tpu.memory_space<vmem>>, vector<1x512xf32>
    %c0_4 = arith.constant 0 : index
    %c0_5 = arith.constant 0 : index
    %c0_6 = arith.constant 0 : index
    %5 = vector.load %arg1[%c0_4, %c0_5, %c0_6] : memref<4x16x16xbf16, #tpu.memory_space<vmem>>, vector<1x16x16xbf16>
    %6 = vector.shape_cast %5 : vector<1x16x16xbf16> to vector<16x16xbf16>
    %cst = arith.constant dense<0.000000e+00> : vector<16x512xf32>
    %7 = tpu.matmul %6, %3, %cst {dimension_numbers = #tpu.dot_dimension_numbers<[1], [0], [0], [1], [0, 0, 1, 1], [], []>} : vector<16x16xbf16>, vector<16x512xbf16>, vector<16x512xf32> -> vector<16x512xf32>
    %8 = vector.broadcast %4 : vector<1x512xf32> to vector<16x512xf32>
    %9 = arith.addf %7, %8 : vector<16x512xf32>
    %c0_7 = arith.constant 0 : index
    %c0_8 = arith.constant 0 : index
    %c0_9 = arith.constant 0 : index
    %10 = vector.load %arg11[%c0_7, %c0_8, %c0_9] : memref<4x16x512xf32, #tpu.memory_space<vmem>>, vector<1x16x512xf32>
    %11 = vector.shape_cast %10 : vector<1x16x512xf32> to vector<16x512xf32>
    %12 = vector.shape_cast %9 : vector<16x512xf32> to vector<1x16x512xf32>
    tpu.vector_store %arg11[%c0_7, %c0_8, %c0_9], %12 {strides = array<i32>} : memref<4x16x512xf32, #tpu.memory_space<vmem>>, vector<1x16x512xf32>,
    %c1 = arith.constant 1 : index
    %c0_10 = arith.constant 0 : index
    %c0_11 = arith.constant 0 : index
    %13 = vector.load %arg1[%c1, %c0_10, %c0_11] : memref<4x16x16xbf16, #tpu.memory_space<vmem>>, vector<1x16x16xbf16>
    %14 = vector.shape_cast %13 : vector<1x16x16xbf16> to vector<16x16xbf16>
    %cst_12 = arith.constant dense<0.000000e+00> : vector<16x512xf32>
    %15 = tpu.matmul %14, %3, %cst_12 {dimension_numbers = #tpu.dot_dimension_numbers<[1], [0], [0], [1], [0, 0, 1, 1], [], []>} : vector<16x16xbf16>, vector<16x512xbf16>, vector<16x512xf32> -> vector<16x512xf32>
    %16 = vector.broadcast %4 : vector<1x512xf32> to vector<16x512xf32>
    %17 = arith.addf %15, %16 : vector<16x512xf32>
    %c1_13 = arith.constant 1 : index
    %c0_14 = arith.constant 0 : index
    %c0_15 = arith.constant 0 : index
    %18 = vector.load %arg11[%c1_13, %c0_14, %c0_15] : memref<4x16x512xf32, #tpu.memory_space<vmem>>, vector<1x16x512xf32>
    %19 = vector.shape_cast %18 : vector<1x16x512xf32> to vector<16x512xf32>
    %20 = vector.shape_cast %17 : vector<16x512xf32> to vector<1x16x512xf32>
    tpu.vector_store %arg11[%c1_13, %c0_14, %c0_15], %20 {strides = array<i32>} : memref<4x16x512xf32, #tpu.memory_space<vmem>>, vector<1x16x512xf32>,
    %c2 = arith.constant 2 : index
    %c0_16 = arith.constant 0 : index
    %c0_17 = arith.constant 0 : index
    %21 = vector.load %arg1[%c2, %c0_16, %c0_17] : memref<4x16x16xbf16, #tpu.memory_space<vmem>>, vector<1x16x16xbf16>
    %22 = vector.shape_cast %21 : vector<1x16x16xbf16> to vector<16x16xbf16>
    %cst_18 = arith.constant dense<0.000000e+00> : vector<16x512xf32>
    %23 = tpu.matmul %22, %3, %cst_18 {dimension_numbers = #tpu.dot_dimension_numbers<[1], [0], [0], [1], [0, 0, 1, 1], [], []>} : vector<16x16xbf16>, vector<16x512xbf16>, vector<16x512xf32> -> vector<16x512xf32>
    %24 = vector.broadcast %4 : vector<1x512xf32> to vector<16x512xf32>
    %25 = arith.addf %23, %24 : vector<16x512xf32>
    %c2_19 = arith.constant 2 : index
    %c0_20 = arith.constant 0 : index
    %c0_21 = arith.constant 0 : index
    %26 = vector.load %arg11[%c2_19, %c0_20, %c0_21] : memref<4x16x512xf32, #tpu.memory_space<vmem>>, vector<1x16x512xf32>
    %27 = vector.shape_cast %26 : vector<1x16x512xf32> to vector<16x512xf32>
    %28 = vector.shape_cast %25 : vector<16x512xf32> to vector<1x16x512xf32>
    tpu.vector_store %arg11[%c2_19, %c0_20, %c0_21], %28 {strides = array<i32>} : memref<4x16x512xf32, #tpu.memory_space<vmem>>, vector<1x16x512xf32>,
    %c3 = arith.constant 3 : index
    %c0_22 = arith.constant 0 : index
    %c0_23 = arith.constant 0 : index
    %29 = vector.load %arg1[%c3, %c0_22, %c0_23] : memref<4x16x16xbf16, #tpu.memory_space<vmem>>, vector<1x16x16xbf16>
    %30 = vector.shape_cast %29 : vector<1x16x16xbf16> to vector<16x16xbf16>
    %cst_24 = arith.constant dense<0.000000e+00> : vector<16x512xf32>
    %31 = tpu.matmul %30, %3, %cst_24 {dimension_numbers = #tpu.dot_dimension_numbers<[1], [0], [0], [1], [0, 0, 1, 1], [], []>} : vector<16x16xbf16>, vector<16x512xbf16>, vector<16x512xf32> -> vector<16x512xf32>
    %32 = vector.broadcast %4 : vector<1x512xf32> to vector<16x512xf32>
    %33 = arith.addf %31, %32 : vector<16x512xf32>
    %c3_25 = arith.constant 3 : index
    %c0_26 = arith.constant 0 : index
    %c0_27 = arith.constant 0 : index
    %34 = vector.load %arg11[%c3_25, %c0_26, %c0_27] : memref<4x16x512xf32, #tpu.memory_space<vmem>>, vector<1x16x512xf32>
    %35 = vector.shape_cast %34 : vector<1x16x512xf32> to vector<16x512xf32>
    %36 = vector.shape_cast %33 : vector<16x512xf32> to vector<1x16x512xf32>
    tpu.vector_store %arg11[%c3_25, %c0_26, %c0_27], %36 {strides = array<i32>} : memref<4x16x512xf32, #tpu.memory_space<vmem>>, vector<1x16x512xf32>,
    %c0_28 = arith.constant 0 : index
    %c0_29 = arith.constant 0 : index
    %37 = vector.load %arg3[%c0_28, %c0_29] : memref<128x512xbf16, #tpu.memory_space<vmem>>, vector<128x512xbf16>
    %cst_30 = arith.constant 0.000000e+00 : f32
    %38 = vector.broadcast %cst_30 : f32 to vector<16x128xf32>
    %c0_i32_31 = arith.constant 0 : i32
    %39 = arith.index_cast %c0_i32_31 : i32 to index
    %c0_32 = arith.constant 0 : index
    %c0_33 = arith.constant 0 : index
    %40 = vector.load %arg11[%39, %c0_32, %c0_33] : memref<4x16x512xf32, #tpu.memory_space<vmem>>, vector<1x16x512xf32>
    %41 = vector.shape_cast %40 : vector<1x16x512xf32> to vector<16x512xf32>
    %42 = arith.truncf %38 : vector<16x128xf32> to vector<16x128xbf16>
    %cst_34 = arith.constant dense<0.000000e+00> : vector<16x512xf32>
    %43 = tpu.matmul %42, %37, %cst_34 {dimension_numbers = #tpu.dot_dimension_numbers<[1], [0], [0], [1], [0, 0, 1, 1], [], []>} : vector<16x128xbf16>, vector<128x512xbf16>, vector<16x512xf32> -> vector<16x512xf32>
    %44 = arith.addf %41, %43 : vector<16x512xf32>
    %45 = vector.extract_strided_slice %44 {offsets = [0, 0], sizes = [16, 128], strides = [1, 1]} : vector<16x512xf32> to vector<16x128xf32>
    %46 = arith.negf %45 : vector<16x128xf32>
    %47 = math.exp %46 : vector<16x128xf32>
    %cst_35 = arith.constant 1.000000e+00 : f32
    %48 = vector.broadcast %cst_35 : f32 to vector<16x128xf32>
    %49 = arith.addf %48, %47 : vector<16x128xf32>
    %50 = arith.divf %48, %49 : vector<16x128xf32>
    %51 = vector.extract_strided_slice %44 {offsets = [0, 128], sizes = [16, 128], strides = [1, 1]} : vector<16x512xf32> to vector<16x128xf32>
    %52 = arith.negf %51 : vector<16x128xf32>
    %53 = math.exp %52 : vector<16x128xf32>
    %cst_36 = arith.constant 1.000000e+00 : f32
    %54 = vector.broadcast %cst_36 : f32 to vector<16x128xf32>
    %55 = arith.addf %54, %53 : vector<16x128xf32>
    %56 = arith.divf %54, %55 : vector<16x128xf32>
    %57 = vector.extract_strided_slice %44 {offsets = [0, 256], sizes = [16, 128], strides = [1, 1]} : vector<16x512xf32> to vector<16x128xf32>
    %58 = math.tanh %57 : vector<16x128xf32>
    %59 = vector.extract_strided_slice %44 {offsets = [0, 384], sizes = [16, 128], strides = [1, 1]} : vector<16x512xf32> to vector<16x128xf32>
    %60 = arith.negf %59 : vector<16x128xf32>
    %61 = math.exp %60 : vector<16x128xf32>
    %cst_37 = arith.constant 1.000000e+00 : f32
    %62 = vector.broadcast %cst_37 : f32 to vector<16x128xf32>
    %63 = arith.addf %62, %61 : vector<16x128xf32>
    %64 = arith.divf %62, %63 : vector<16x128xf32>
    %65 = arith.mulf %56, %38 : vector<16x128xf32>
    %66 = arith.mulf %50, %58 : vector<16x128xf32>
    %67 = arith.addf %65, %66 : vector<16x128xf32>
    %68 = math.tanh %67 : vector<16x128xf32>
    %69 = arith.mulf %64, %68 : vector<16x128xf32>
    %c1_i32 = arith.constant 1 : i32
    %70 = arith.index_cast %c1_i32 : i32 to index
    %c0_38 = arith.constant 0 : index
    %c0_39 = arith.constant 0 : index
    %71 = vector.load %arg11[%70, %c0_38, %c0_39] : memref<4x16x512xf32, #tpu.memory_space<vmem>>, vector<1x16x512xf32>
    %72 = vector.shape_cast %71 : vector<1x16x512xf32> to vector<16x512xf32>
    %73 = arith.truncf %69 : vector<16x128xf32> to vector<16x128xbf16>
    %cst_40 = arith.constant dense<0.000000e+00> : vector<16x512xf32>
    %74 = tpu.matmul %73, %37, %cst_40 {dimension_numbers = #tpu.dot_dimension_numbers<[1], [0], [0], [1], [0, 0, 1, 1], [], []>} : vector<16x128xbf16>, vector<128x512xbf16>, vector<16x512xf32> -> vector<16x512xf32>
    %75 = arith.addf %72, %74 : vector<16x512xf32>
    %76 = vector.extract_strided_slice %75 {offsets = [0, 0], sizes = [16, 128], strides = [1, 1]} : vector<16x512xf32> to vector<16x128xf32>
    %77 = arith.negf %76 : vector<16x128xf32>
    %78 = math.exp %77 : vector<16x128xf32>
    %cst_41 = arith.constant 1.000000e+00 : f32
    %79 = vector.broadcast %cst_41 : f32 to vector<16x128xf32>
    %80 = arith.addf %79, %78 : vector<16x128xf32>
    %81 = arith.divf %79, %80 : vector<16x128xf32>
    %82 = vector.extract_strided_slice %75 {offsets = [0, 128], sizes = [16, 128], strides = [1, 1]} : vector<16x512xf32> to vector<16x128xf32>
    %83 = arith.negf %82 : vector<16x128xf32>
    %84 = math.exp %83 : vector<16x128xf32>
    %cst_42 = arith.constant 1.000000e+00 : f32
    %85 = vector.broadcast %cst_42 : f32 to vector<16x128xf32>
    %86 = arith.addf %85, %84 : vector<16x128xf32>
    %87 = arith.divf %85, %86 : vector<16x128xf32>
    %88 = vector.extract_strided_slice %75 {offsets = [0, 256], sizes = [16, 128], strides = [1, 1]} : vector<16x512xf32> to vector<16x128xf32>
    %89 = math.tanh %88 : vector<16x128xf32>
    %90 = vector.extract_strided_slice %75 {offsets = [0, 384], sizes = [16, 128], strides = [1, 1]} : vector<16x512xf32> to vector<16x128xf32>
    %91 = arith.negf %90 : vector<16x128xf32>
    %92 = math.exp %91 : vector<16x128xf32>
    %cst_43 = arith.constant 1.000000e+00 : f32
    %93 = vector.broadcast %cst_43 : f32 to vector<16x128xf32>
    %94 = arith.addf %93, %92 : vector<16x128xf32>
    %95 = arith.divf %93, %94 : vector<16x128xf32>
    %96 = arith.mulf %87, %67 : vector<16x128xf32>
    %97 = arith.mulf %81, %89 : vector<16x128xf32>
    %98 = arith.addf %96, %97 : vector<16x128xf32>
    %99 = math.tanh %98 : vector<16x128xf32>
    %100 = arith.mulf %95, %99 : vector<16x128xf32>
    %c2_i32 = arith.constant 2 : i32
    %101 = arith.index_cast %c2_i32 : i32 to index
    %c0_44 = arith.constant 0 : index
    %c0_45 = arith.constant 0 : index
    %102 = vector.load %arg11[%101, %c0_44, %c0_45] : memref<4x16x512xf32, #tpu.memory_space<vmem>>, vector<1x16x512xf32>
    %103 = vector.shape_cast %102 : vector<1x16x512xf32> to vector<16x512xf32>
    %104 = arith.truncf %100 : vector<16x128xf32> to vector<16x128xbf16>
    %cst_46 = arith.constant dense<0.000000e+00> : vector<16x512xf32>
    %105 = tpu.matmul %104, %37, %cst_46 {dimension_numbers = #tpu.dot_dimension_numbers<[1], [0], [0], [1], [0, 0, 1, 1], [], []>} : vector<16x128xbf16>, vector<128x512xbf16>, vector<16x512xf32> -> vector<16x512xf32>
    %106 = arith.addf %103, %105 : vector<16x512xf32>
    %107 = vector.extract_strided_slice %106 {offsets = [0, 0], sizes = [16, 128], strides = [1, 1]} : vector<16x512xf32> to vector<16x128xf32>
    %108 = arith.negf %107 : vector<16x128xf32>
    %109 = math.exp %108 : vector<16x128xf32>
    %cst_47 = arith.constant 1.000000e+00 : f32
    %110 = vector.broadcast %cst_47 : f32 to vector<16x128xf32>
    %111 = arith.addf %110, %109 : vector<16x128xf32>
    %112 = arith.divf %110, %111 : vector<16x128xf32>
    %113 = vector.extract_strided_slice %106 {offsets = [0, 128], sizes = [16, 128], strides = [1, 1]} : vector<16x512xf32> to vector<16x128xf32>
    %114 = arith.negf %113 : vector<16x128xf32>
    %115 = math.exp %114 : vector<16x128xf32>
    %cst_48 = arith.constant 1.000000e+00 : f32
    %116 = vector.broadcast %cst_48 : f32 to vector<16x128xf32>
    %117 = arith.addf %116, %115 : vector<16x128xf32>
    %118 = arith.divf %116, %117 : vector<16x128xf32>
    %119 = vector.extract_strided_slice %106 {offsets = [0, 256], sizes = [16, 128], strides = [1, 1]} : vector<16x512xf32> to vector<16x128xf32>
    %120 = math.tanh %119 : vector<16x128xf32>
    %121 = vector.extract_strided_slice %106 {offsets = [0, 384], sizes = [16, 128], strides = [1, 1]} : vector<16x512xf32> to vector<16x128xf32>
    %122 = arith.negf %121 : vector<16x128xf32>
    %123 = math.exp %122 : vector<16x128xf32>
    %cst_49 = arith.constant 1.000000e+00 : f32
    %124 = vector.broadcast %cst_49 : f32 to vector<16x128xf32>
    %125 = arith.addf %124, %123 : vector<16x128xf32>
    %126 = arith.divf %124, %125 : vector<16x128xf32>
    %127 = arith.mulf %118, %98 : vector<16x128xf32>
    %128 = arith.mulf %112, %120 : vector<16x128xf32>
    %129 = arith.addf %127, %128 : vector<16x128xf32>
    %130 = math.tanh %129 : vector<16x128xf32>
    %131 = arith.mulf %126, %130 : vector<16x128xf32>
    %c3_i32 = arith.constant 3 : i32
    %132 = arith.index_cast %c3_i32 : i32 to index
    %c0_50 = arith.constant 0 : index
    %c0_51 = arith.constant 0 : index
    %133 = vector.load %arg11[%132, %c0_50, %c0_51] : memref<4x16x512xf32, #tpu.memory_space<vmem>>, vector<1x16x512xf32>
    %134 = vector.shape_cast %133 : vector<1x16x512xf32> to vector<16x512xf32>
    %135 = arith.truncf %131 : vector<16x128xf32> to vector<16x128xbf16>
    %cst_52 = arith.constant dense<0.000000e+00> : vector<16x512xf32>
    %136 = tpu.matmul %135, %37, %cst_52 {dimension_numbers = #tpu.dot_dimension_numbers<[1], [0], [0], [1], [0, 0, 1, 1], [], []>} : vector<16x128xbf16>, vector<128x512xbf16>, vector<16x512xf32> -> vector<16x512xf32>
    %137 = arith.addf %134, %136 : vector<16x512xf32>
    %138 = vector.extract_strided_slice %137 {offsets = [0, 0], sizes = [16, 128], strides = [1, 1]} : vector<16x512xf32> to vector<16x128xf32>
    %139 = arith.negf %138 : vector<16x128xf32>
    %140 = math.exp %139 : vector<16x128xf32>
    %cst_53 = arith.constant 1.000000e+00 : f32
    %141 = vector.broadcast %cst_53 : f32 to vector<16x128xf32>
    %142 = arith.addf %141, %140 : vector<16x128xf32>
    %143 = arith.divf %141, %142 : vector<16x128xf32>
    %144 = vector.extract_strided_slice %137 {offsets = [0, 128], sizes = [16, 128], strides = [1, 1]} : vector<16x512xf32> to vector<16x128xf32>
    %145 = arith.negf %144 : vector<16x128xf32>
    %146 = math.exp %145 : vector<16x128xf32>
    %cst_54 = arith.constant 1.000000e+00 : f32
    %147 = vector.broadcast %cst_54 : f32 to vector<16x128xf32>
    %148 = arith.addf %147, %146 : vector<16x128xf32>
    %149 = arith.divf %147, %148 : vector<16x128xf32>
    %150 = vector.extract_strided_slice %137 {offsets = [0, 256], sizes = [16, 128], strides = [1, 1]} : vector<16x512xf32> to vector<16x128xf32>
    %151 = math.tanh %150 : vector<16x128xf32>
    %152 = vector.extract_strided_slice %137 {offsets = [0, 384], sizes = [16, 128], strides = [1, 1]} : vector<16x512xf32> to vector<16x128xf32>
    %153 = arith.negf %152 : vector<16x128xf32>
    %154 = math.exp %153 : vector<16x128xf32>
    %cst_55 = arith.constant 1.000000e+00 : f32
    %155 = vector.broadcast %cst_55 : f32 to vector<16x128xf32>
    %156 = arith.addf %155, %154 : vector<16x128xf32>
    %157 = arith.divf %155, %156 : vector<16x128xf32>
    %158 = arith.mulf %149, %129 : vector<16x128xf32>
    %159 = arith.mulf %143, %151 : vector<16x128xf32>
    %160 = arith.addf %158, %159 : vector<16x128xf32>
    %161 = math.tanh %160 : vector<16x128xf32>
    %162 = arith.mulf %157, %161 : vector<16x128xf32>
    %c4_i32 = arith.constant 4 : i32
    %163 = arith.truncf %162 : vector<16x128xf32> to vector<16x128xbf16>
    %c0_56 = arith.constant 0 : index
    %c0_57 = arith.constant 0 : index
    %164 = vector.load %arg5[%c0_56, %c0_57] : memref<128x512xbf16, #tpu.memory_space<vmem>>, vector<128x512xbf16>
    %cst_58 = arith.constant dense<0.000000e+00> : vector<16x512xf32>
    %165 = tpu.matmul %163, %164, %cst_58 {dimension_numbers = #tpu.dot_dimension_numbers<[1], [0], [0], [1], [0, 0, 1, 1], [], []>} : vector<16x128xbf16>, vector<128x512xbf16>, vector<16x512xf32> -> vector<16x512xf32>
    %c0_59 = arith.constant 0 : index
    %c0_60 = arith.constant 0 : index
    %166 = vector.load %arg7[%c0_59, %c0_60] : memref<1x512xf32, #tpu.memory_space<vmem>>, vector<1x512xf32>
    %167 = vector.broadcast %166 : vector<1x512xf32> to vector<16x512xf32>
    %168 = arith.addf %165, %167 : vector<16x512xf32>
    %c0_61 = arith.constant 0 : index
    %c0_62 = arith.constant 0 : index
    %169 = vector.load %arg12[%c0_61, %c0_62] : memref<16x512xf32, #tpu.memory_space<vmem>>, vector<16x512xf32>
    tpu.vector_store %arg12[%c0_61, %c0_62], %168 {strides = array<i32>} : memref<16x512xf32, #tpu.memory_space<vmem>>, vector<16x512xf32>,
    %c0_63 = arith.constant 0 : index
    %c0_64 = arith.constant 0 : index
    %170 = vector.load %arg6[%c0_63, %c0_64] : memref<128x512xbf16, #tpu.memory_space<vmem>>, vector<128x512xbf16>
    %c0_65 = arith.constant 0 : index
    %c0_66 = arith.constant 0 : index
    %171 = vector.load %arg13[%c0_65, %c0_66] : memref<8x128xf32, #tpu.memory_space<vmem>>, vector<8x128xf32>
    %c0_67 = arith.constant 0 : index
    %c0_68 = arith.constant 0 : index
    %172 = vector.load %arg14[%c0_67, %c0_68] : memref<8x128xf32, #tpu.memory_space<vmem>>, vector<8x128xf32>
    %c0_i32_69 = arith.constant 0 : i32
    %c8_i32 = arith.constant 8 : i32
    %173 = arith.muli %c0_i32_69, %c8_i32 : i32
    %174 = tpu.assume_multiple %173, 8 : i32
    %175 = arith.index_cast %174 : i32 to index
    %c0_70 = arith.constant 0 : index
    %176 = vector.load %arg12[%175, %c0_70] : memref<16x512xf32, #tpu.memory_space<vmem>>, vector<8x512xf32>
    %177 = arith.truncf %171 : vector<8x128xf32> to vector<8x128xbf16>
    %cst_71 = arith.constant dense<0.000000e+00> : vector<8x512xf32>
    %178 = tpu.matmul %177, %170, %cst_71 {dimension_numbers = #tpu.dot_dimension_numbers<[1], [0], [0], [1], [0, 0, 1, 1], [], []>} : vector<8x128xbf16>, vector<128x512xbf16>, vector<8x512xf32> -> vector<8x512xf32>
    %179 = arith.addf %176, %178 : vector<8x512xf32>
    %180 = vector.extract_strided_slice %179 {offsets = [0, 0], sizes = [8, 128], strides = [1, 1]} : vector<8x512xf32> to vector<8x128xf32>
    %181 = arith.negf %180 : vector<8x128xf32>
    %182 = math.exp %181 : vector<8x128xf32>
    %cst_72 = arith.constant 1.000000e+00 : f32
    %183 = vector.broadcast %cst_72 : f32 to vector<8x128xf32>
    %184 = arith.addf %183, %182 : vector<8x128xf32>
    %185 = arith.divf %183, %184 : vector<8x128xf32>
    %186 = vector.extract_strided_slice %179 {offsets = [0, 128], sizes = [8, 128], strides = [1, 1]} : vector<8x512xf32> to vector<8x128xf32>
    %187 = arith.negf %186 : vector<8x128xf32>
    %188 = math.exp %187 : vector<8x128xf32>
    %cst_73 = arith.constant 1.000000e+00 : f32
    %189 = vector.broadcast %cst_73 : f32 to vector<8x128xf32>
    %190 = arith.addf %189, %188 : vector<8x128xf32>
    %191 = arith.divf %189, %190 : vector<8x128xf32>
    %192 = vector.extract_strided_slice %179 {offsets = [0, 256], sizes = [8, 128], strides = [1, 1]} : vector<8x512xf32> to vector<8x128xf32>
    %193 = math.tanh %192 : vector<8x128xf32>
    %194 = vector.extract_strided_slice %179 {offsets = [0, 384], sizes = [8, 128], strides = [1, 1]} : vector<8x512xf32> to vector<8x128xf32>
    %195 = arith.negf %194 : vector<8x128xf32>
    %196 = math.exp %195 : vector<8x128xf32>
    %cst_74 = arith.constant 1.000000e+00 : f32
    %197 = vector.broadcast %cst_74 : f32 to vector<8x128xf32>
    %198 = arith.addf %197, %196 : vector<8x128xf32>
    %199 = arith.divf %197, %198 : vector<8x128xf32>
    %200 = arith.mulf %191, %172 : vector<8x128xf32>
    %201 = arith.mulf %185, %193 : vector<8x128xf32>
    %202 = arith.addf %200, %201 : vector<8x128xf32>
    %203 = math.tanh %202 : vector<8x128xf32>
    %204 = arith.mulf %199, %203 : vector<8x128xf32>
    %c1_i32_75 = arith.constant 1 : i32
    %c8_i32_76 = arith.constant 8 : i32
    %205 = arith.muli %c1_i32_75, %c8_i32_76 : i32
    %206 = tpu.assume_multiple %205, 8 : i32
    %207 = arith.index_cast %206 : i32 to index
    %c0_77 = arith.constant 0 : index
    %208 = vector.load %arg12[%207, %c0_77] : memref<16x512xf32, #tpu.memory_space<vmem>>, vector<8x512xf32>
    %209 = arith.truncf %204 : vector<8x128xf32> to vector<8x128xbf16>
    %cst_78 = arith.constant dense<0.000000e+00> : vector<8x512xf32>
    %210 = tpu.matmul %209, %170, %cst_78 {dimension_numbers = #tpu.dot_dimension_numbers<[1], [0], [0], [1], [0, 0, 1, 1], [], []>} : vector<8x128xbf16>, vector<128x512xbf16>, vector<8x512xf32> -> vector<8x512xf32>
    %211 = arith.addf %208, %210 : vector<8x512xf32>
    %212 = vector.extract_strided_slice %211 {offsets = [0, 0], sizes = [8, 128], strides = [1, 1]} : vector<8x512xf32> to vector<8x128xf32>
    %213 = arith.negf %212 : vector<8x128xf32>
    %214 = math.exp %213 : vector<8x128xf32>
    %cst_79 = arith.constant 1.000000e+00 : f32
    %215 = vector.broadcast %cst_79 : f32 to vector<8x128xf32>
    %216 = arith.addf %215, %214 : vector<8x128xf32>
    %217 = arith.divf %215, %216 : vector<8x128xf32>
    %218 = vector.extract_strided_slice %211 {offsets = [0, 128], sizes = [8, 128], strides = [1, 1]} : vector<8x512xf32> to vector<8x128xf32>
    %219 = arith.negf %218 : vector<8x128xf32>
    %220 = math.exp %219 : vector<8x128xf32>
    %cst_80 = arith.constant 1.000000e+00 : f32
    %221 = vector.broadcast %cst_80 : f32 to vector<8x128xf32>
    %222 = arith.addf %221, %220 : vector<8x128xf32>
    %223 = arith.divf %221, %222 : vector<8x128xf32>
    %224 = vector.extract_strided_slice %211 {offsets = [0, 256], sizes = [8, 128], strides = [1, 1]} : vector<8x512xf32> to vector<8x128xf32>
    %225 = math.tanh %224 : vector<8x128xf32>
    %226 = vector.extract_strided_slice %211 {offsets = [0, 384], sizes = [8, 128], strides = [1, 1]} : vector<8x512xf32> to vector<8x128xf32>
    %227 = arith.negf %226 : vector<8x128xf32>
    %228 = math.exp %227 : vector<8x128xf32>
    %cst_81 = arith.constant 1.000000e+00 : f32
    %229 = vector.broadcast %cst_81 : f32 to vector<8x128xf32>
    %230 = arith.addf %229, %228 : vector<8x128xf32>
    %231 = arith.divf %229, %230 : vector<8x128xf32>
    %232 = arith.mulf %223, %202 : vector<8x128xf32>
    %233 = arith.mulf %217, %225 : vector<8x128xf32>
    %234 = arith.addf %232, %233 : vector<8x128xf32>
    %235 = math.tanh %234 : vector<8x128xf32>
    %236 = arith.mulf %231, %235 : vector<8x128xf32>
    %c2_i32_82 = arith.constant 2 : i32
    %c0_83 = arith.constant 0 : index
    %c0_84 = arith.constant 0 : index
    %237 = vector.load %arg13[%c0_83, %c0_84] : memref<8x128xf32, #tpu.memory_space<vmem>>, vector<8x128xf32>
    tpu.vector_store %arg13[%c0_83, %c0_84], %236 {strides = array<i32>} : memref<8x128xf32, #tpu.memory_space<vmem>>, vector<8x128xf32>,
    %c0_85 = arith.constant 0 : index
    %c0_86 = arith.constant 0 : index
    %238 = vector.load %arg14[%c0_85, %c0_86] : memref<8x128xf32, #tpu.memory_space<vmem>>, vector<8x128xf32>
    tpu.vector_store %arg14[%c0_85, %c0_86], %234 {strides = array<i32>} : memref<8x128xf32, #tpu.memory_space<vmem>>, vector<8x128xf32>,
    %c0_i32_87 = arith.constant 0 : i32
    %239 = arith.cmpi eq, %arg0, %c0_i32_87 : i32
    %240 = arith.extui %239 : i1 to i32
    %c0_i32_88 = arith.constant 0 : i32
    %241 = arith.cmpi ne, %240, %c0_i32_88 : i32
    scf.if %241 {
      %242 = arith.truncf %236 : vector<8x128xf32> to vector<8x128xbf16>
      %c0_89 = arith.constant 0 : index
      %c0_90 = arith.constant 0 : index
      %243 = vector.load %arg8[%c0_89, %c0_90] : memref<128x128xbf16, #tpu.memory_space<vmem>>, vector<128x128xbf16>
      %cst_91 = arith.constant dense<0.000000e+00> : vector<8x128xf32>
      %244 = tpu.matmul %242, %243, %cst_91 {dimension_numbers = #tpu.dot_dimension_numbers<[1], [0], [0], [1], [0, 0, 1, 1], [], []>} : vector<8x128xbf16>, vector<128x128xbf16>, vector<8x128xf32> -> vector<8x128xf32>
      %c0_92 = arith.constant 0 : index
      %c0_93 = arith.constant 0 : index
      %245 = vector.load %arg9[%c0_92, %c0_93] : memref<1x128xf32, #tpu.memory_space<vmem>>, vector<1x128xf32>
      %246 = vector.broadcast %245 : vector<1x128xf32> to vector<8x128xf32>
      %247 = arith.addf %244, %246 : vector<8x128xf32>
      %c0_94 = arith.constant 0 : index
      %c0_95 = arith.constant 0 : index
      %248 = vector.load %arg10[%c0_94, %c0_95] : memref<8x128xf32, #tpu.memory_space<vmem>>, vector<8x128xf32>
      tpu.vector_store %arg10[%c0_94, %c0_95], %247 {strides = array<i32>} : memref<8x128xf32, #tpu.memory_space<vmem>>, vector<8x128xf32>,
    } else {
    }
    return
  }
  func.func @transform_0(%arg0: i32) -> (i32, i32, i32) {
    %c0_i32 = arith.constant 0 : i32
    %c0_i32_0 = arith.constant 0 : i32
    %c0_i32_1 = arith.constant 0 : i32
    return %c0_i32, %arg0, %c0_i32_0 : i32, i32, i32
  }
  func.func @transform_1(%arg0: i32) -> (i32, i32) {
    %c0_i32 = arith.constant 0 : i32
    %c0_i32_0 = arith.constant 0 : i32
    %c0_i32_1 = arith.constant 0 : i32
    return %c0_i32, %c0_i32_0 : i32, i32
  }
  func.func @transform_2(%arg0: i32) -> (i32, i32) {
    %c0_i32 = arith.constant 0 : i32
    %c0_i32_0 = arith.constant 0 : i32
    %c0_i32_1 = arith.constant 0 : i32
    return %c0_i32, %c0_i32_0 : i32, i32
  }
  func.func @transform_3(%arg0: i32) -> (i32, i32) {
    %c0_i32 = arith.constant 0 : i32
    %c0_i32_0 = arith.constant 0 : i32
    %c0_i32_1 = arith.constant 0 : i32
    return %c0_i32, %c0_i32_0 : i32, i32
  }
  func.func @transform_4(%arg0: i32) -> (i32, i32) {
    %c0_i32 = arith.constant 0 : i32
    %c0_i32_0 = arith.constant 0 : i32
    %c0_i32_1 = arith.constant 0 : i32
    return %c0_i32, %c0_i32_0 : i32, i32
  }
  func.func @transform_5(%arg0: i32) -> (i32, i32) {
    %c0_i32 = arith.constant 0 : i32
    %c0_i32_0 = arith.constant 0 : i32
    %c0_i32_1 = arith.constant 0 : i32
    return %c0_i32, %c0_i32_0 : i32, i32
  }
  func.func @transform_6(%arg0: i32) -> (i32, i32) {
    %c0_i32 = arith.constant 0 : i32
    %c0_i32_0 = arith.constant 0 : i32
    %c0_i32_1 = arith.constant 0 : i32
    return %c0_i32, %c0_i32_0 : i32, i32
  }
  func.func @transform_7(%arg0: i32) -> (i32, i32) {
    %c0_i32 = arith.constant 0 : i32
    %c0_i32_0 = arith.constant 0 : i32
    %c0_i32_1 = arith.constant 0 : i32
    return %c0_i32, %c0_i32_0 : i32, i32
  }
  func.func @transform_8(%arg0: i32) -> (i32, i32) {
    %c0_i32 = arith.constant 0 : i32
    %c0_i32_0 = arith.constant 0 : i32
    %c0_i32_1 = arith.constant 0 : i32
    return %c0_i32, %c0_i32_0 : i32, i32
  }
  func.func @transform_9(%arg0: i32) -> (i32, i32) {
    %c0_i32 = arith.constant 0 : i32
    %c0_i32_0 = arith.constant 0 : i32
    %c0_i32_1 = arith.constant 0 : i32
    return %c0_i32, %c0_i32_0 : i32, i32
  }
}

</mosaic_0001>

<bundles_post_ra>
// kernel: shallow_rnn_forward.1
= control target key start
LH: loop header
LB: loop body
LE: loop exit
PB: predicated region body
PF: predicated region fallthrough
CT: control target
= control target key end

     0   :  { %v2741_v1 = vmov 0   ;;  %vm92_vm0 = vcmask 130048   ;;  %v47_v49 = vlaneseq  ;;  %vm2744_vm1 = vmmov 0   ;;  %s3521_s1 = inlined_call_operand.vmem [shape: bf16[16,512], index: 1, kind: input, shape index: {}]   ;;  %s3522_s0 = inlined_call_operand.vmem [shape: bf16[4,16,16], index: 0, kind: input, shape index: {}]   ;;  %s3523_s2 = inlined_call_operand.vmem [shape: bf16[128,512], index: 2, kind: input, shape index: {}]   ;;  %s3524_s3 = inlined_call_operand.vmem [shape: f32[1,512], index: 3, kind: input, shape index: {}]   ;;  %s3525_s4 = inlined_call_operand.vmem [shape: bf16[128,512], index: 4, kind: input, shape index: {}]   ;;  %s3526_s5 = inlined_call_operand.vmem [shape: bf16[128,512], index: 5, kind: input, shape index: {}]   ;;  %s3527_s6 = inlined_call_operand.vmem [shape: f32[1,512], index: 6, kind: input, shape index: {}]   ;;  %s3528_s7 = inlined_call_operand.vmem [shape: bf16[128,128], index: 7, kind: input, shape index: {}]   ;;  %s3529_s8 = inlined_call_operand.vmem [shape: f32[1,128], index: 8, kind: input, shape index: {}]   ;;  %s3530_s9 = inlined_call_operand.vmem [shape: f32[8,128], index: 9, kind: output, shape index: {}]  }
   0x1   :  { %v2419_v0 = vld [vmem:[%s3521_s1 + $0x4] ss:$16 sps:$4 sm:$0xff]   ;;  %128 = vmatprep.mubr.bf16.mxu1 %v2741_v1  ;;  %339 = vmatprep.mubr.bf16.mxu0 %v2741_v1  ;;  %v2421_v2 = vld [vmem:[%s3521_s1] ss:$16 sps:$4 sm:$0xff]   ;;  %v2423_v4 = vld [vmem:[%s3521_s1 + $0xc] ss:$16 sps:$4 sm:$0xff]  }
   0x2   :  { %96 = vmatprep.subr.bf16.mxu1 %v2419_v0  ;;  %307 = vmatprep.subr.bf16.mxu0 %v2419_v0  ;;  %v2422_v3 = vld [vmem:[%s3522_s0] sm:$0xff]   ;;  %v2425_v5 = vld [vmem:[%s3522_s0 + $0x10] sm:$0xff]   ;;  %v2426_v6 = vld [vmem:[%s3521_s1 + $0x8] ss:$16 sps:$4 sm:$0xff]   ;;  %v3075_v50 = vshrl.u32 %v47_v49, 7 }
   0x3   :  { %97 = vmatpush1.bf16.msra.mxu1 %v2421_v2  ;;  %308 = vmatpush1.bf16.msra.mxu0 %v2421_v2  ;;  %v2818_v7 = vld [vmem:[%s3523_s2 + $0x4] ss:$16 sps:$4 sm:$0xff]   ;;  %v2429_v8 = vld [vmem:[%s3522_s0 + $0x18] sm:$0xff]   ;;  %v2831_v9 = vld [vmem:[%s3523_s2] ss:$16 sps:$4 sm:$0xff]  }
   0x4   :  { %413 = vmatprep.subr.bf16.mxu0 %v2419_v0  ;;  %139 = vmatprep.subr.bf16.mxu1 %v2423_v4  ;;  %v2836_v10 = vld [vmem:[%s3523_s2 + $0x24] ss:$16 sps:$4 sm:$0xff]   ;;  %v2844_v11 = vld [vmem:[%s3523_s2 + $0x20] ss:$16 sps:$4 sm:$0xff]   ;;  %v2436_v13 = vld [vmem:[%s3522_s0 + $0x8] sm:$0xff]   ;;  %v49_v51 = vsub.s32 0, %v3075_v50 }
   0x5   :  { %v2851_v12 = vld [vmem:[%s3523_s2 + $0x44] ss:$16 sps:$4 sm:$0xff]   ;;  %v2861_v14 = vld [vmem:[%s3523_s2 + $0x40] ss:$16 sps:$4 sm:$0xff]   ;;  %v2924_v24 = vld [vmem:[%s3523_s2 + $0xc] ss:$16 sps:$4 sm:$0xff]  }
   0x6   :  { %2170 = vmatmul.mubr.msk.bf16.vlgmr.msra.gmra.mrb[0].mxu1 %vm92_vm0, %v2422_v3  ;;  %2180 = vmatmul.mubr.msk.bf16.vlgmr.msra.gmra.mrb[0].mxu0 %vm92_vm0, %v2425_v5  ;;  %v2867_v15 = vld [vmem:[%s3523_s2 + $0x64] ss:$16 sps:$4 sm:$0xff]   ;;  %v2874_v16 = vld [vmem:[%s3523_s2 + $0x60] ss:$16 sps:$4 sm:$0xff]   ;;  %v2940_v26 = vld [vmem:[%s3523_s2 + $0x8] ss:$16 sps:$4 sm:$0xff]  }
   0x7   :  { %140 = vmatpush1.bf16.msra.mxu1 %v2426_v6  ;;  %414 = vmatpush1.bf16.msra.mxu0 %v2421_v2  ;;  %v2881_v17 = vld [vmem:[%s3523_s2 + $0x84] ss:$16 sps:$4 sm:$0xff]   ;;  %v2887_v18 = vld [vmem:[%s3523_s2 + $0x80] ss:$16 sps:$4 sm:$0xff]   ;;  %v2945_v27 = vld [vmem:[%s3523_s2 + $0x2c] ss:$16 sps:$4 sm:$0xff]  }
   0x8   :  { %171 = vmatprep.mubr.bf16.mxu1 %v2741_v1  ;;  %445 = vmatprep.mubr.bf16.mxu0 %v2741_v1  ;;  %v2893_v19 = vld [vmem:[%s3523_s2 + $0xa4] ss:$16 sps:$4 sm:$0xff]   ;;  %v2900_v20 = vld [vmem:[%s3523_s2 + $0xa0] ss:$16 sps:$4 sm:$0xff]   ;;  %v2954_v28 = vld [vmem:[%s3523_s2 + $0x28] ss:$16 sps:$4 sm:$0xff]  }
   0x9   :  { %708 = vmatprep.subr.bf16.mxu0 %v2818_v7  ;;  %201 = vmatprep.subr.bf16.mxu1 %v2419_v0  ;;  %v2907_v21 = vld [vmem:[%s3523_s2 + $0xc4] ss:$16 sps:$4 sm:$0xff]   ;;  %v2913_v22 = vld [vmem:[%s3523_s2 + $0xc0] ss:$16 sps:$4 sm:$0xff]   ;;  %v2961_v29 = vld [vmem:[%s3523_s2 + $0x4c] ss:$16 sps:$4 sm:$0xff]  }
   0xa   :  { %v2919_v23 = vld [vmem:[%s3523_s2 + $0xe4] ss:$16 sps:$4 sm:$0xff]   ;;  %v2931_v25 = vld [vmem:[%s3523_s2 + $0xe0] ss:$16 sps:$4 sm:$0xff]   ;;  %v2970_v30 = vld [vmem:[%s3523_s2 + $0x48] ss:$16 sps:$4 sm:$0xff]  }
   0xb   :  { %v2976_v31 = vld [vmem:[%s3523_s2 + $0x6c] ss:$16 sps:$4 sm:$0xff]   ;;  %v2984_v32 = vld [vmem:[%s3523_s2 + $0x68] ss:$16 sps:$4 sm:$0xff]   ;;  %v43_v52 = vld [vmem:[%s3524_s3] sm:$0xf] }
   0xc   :  { %v2990_v33 = vld [vmem:[%s3523_s2 + $0x8c] ss:$16 sps:$4 sm:$0xff]   ;;  %v2998_v34 = vld [vmem:[%s3523_s2 + $0x88] ss:$16 sps:$4 sm:$0xff]   ;;  %v53_v53 = vsub.s32 1, %v3075_v50  ;;  %v3084_v54 = vrot.slane %v43_v52, %v49_v51  ;;  %v3531_v49 = vsub.s32 3, %v3075_v50 }
   0xd   :  { %v3004_v35 = vld [vmem:[%s3523_s2 + $0xac] ss:$16 sps:$4 sm:$0xff]   ;;  %v3012_v36 = vld [vmem:[%s3523_s2 + $0xa8] ss:$16 sps:$4 sm:$0xff]  }
   0xe   :  { %2171 = vmatmul.mubr.msk.bf16.vlgmr.msra.gmra.mrb[4].mxu1 %vm92_vm0, %v2422_v3  ;;  %2185 = vmatmul.mubr.msk.bf16.vlgmr.msra.gmra.mrb[4].mxu0 %vm92_vm0, %v2429_v8  ;;  %v3018_v37 = vld [vmem:[%s3523_s2 + $0xcc] ss:$16 sps:$4 sm:$0xff]   ;;  %v3026_v38 = vld [vmem:[%s3523_s2 + $0xc8] ss:$16 sps:$4 sm:$0xff]   ;;  %v3088_v55 = vrot.slane %v43_v52, %v53_v53 }
   0xf   :  { %709 = vmatpush1.bf16.msra.mxu0 %v2831_v9  ;;  %202 = vmatpush1.bf16.msra.mxu1 %v2421_v2  ;;  %v3032_v39 = vld [vmem:[%s3523_s2 + $0xec] ss:$16 sps:$4 sm:$0xff]   ;;  %v3040_v40 = vld [vmem:[%s3523_s2 + $0xe8] ss:$16 sps:$4 sm:$0xff]  }
  0x10   :  { %710 = vmatprep.subr.bf16.mxu0 %v2836_v10  ;;  %233 = vmatprep.mubr.bf16.mxu1 %v2741_v1 }
  0x11   :  { %244 = vmatprep.subr.bf16.mxu1 %v2423_v4  ;;  %740 = vmatprep.mubr.bf16.mxu0 %v2741_v1 }
  0x13   :  { %711 = vmatpush1.bf16.msra.mxu0 %v2844_v11 }
  0x14   :  { %712 = vmatprep.subr.bf16.mxu0 %v2851_v12 }
  0x16   :  { %2175 = vmatmul.mubr.msk.bf16.vlgmr.msra.gmra.mrb[8].mxu1 %vm92_vm0, %v2436_v13 }
  0x17   :  { %713 = vmatpush1.bf16.msra.mxu0 %v2861_v14  ;;  %245 = vmatpush1.bf16.msra.mxu1 %v2426_v6 }
  0x18   :  { %714 = vmatprep.subr.bf16.mxu0 %v2867_v15  ;;  %276 = vmatprep.mubr.bf16.mxu1 %v2741_v1 }
  0x19   :  { %350 = vmatprep.subr.bf16.mxu1 %v2423_v4 }
  0x1b   :  { %715 = vmatpush1.bf16.msra.mxu0 %v2874_v16 }
  0x1c   :  { %716 = vmatprep.subr.bf16.mxu0 %v2881_v17 }
  0x1e   :  { %2176 = vmatmul.mubr.msk.bf16.vlgmr.msra.gmra.mrb[12].mxu1 %vm92_vm0, %v2436_v13 }
  0x1f   :  { %717 = vmatpush1.bf16.msra.mxu0 %v2887_v18  ;;  %351 = vmatpush1.bf16.msra.mxu1 %v2426_v6 }
  0x20   :  { %718 = vmatprep.subr.bf16.mxu0 %v2893_v19  ;;  %382 = vmatprep.mubr.bf16.mxu1 %v2741_v1 }
  0x21   :  { %456 = vmatprep.subr.bf16.mxu1 %v2423_v4 }
  0x23   :  { %719 = vmatpush1.bf16.msra.mxu0 %v2900_v20 }
  0x24   :  { %720 = vmatprep.subr.bf16.mxu0 %v2907_v21 }
  0x26   :  { %2181 = vmatmul.mubr.msk.bf16.vlgmr.msra.gmra.mrb[16].mxu1 %vm92_vm0, %v2425_v5 }
  0x27   :  { %721 = vmatpush1.bf16.msra.mxu0 %v2913_v22  ;;  %457 = vmatpush1.bf16.msra.mxu1 %v2426_v6 }
  0x28   :  { %722 = vmatprep.subr.bf16.mxu0 %v2919_v23  ;;  %488 = vmatprep.mubr.bf16.mxu1 %v2741_v1 }
  0x29   :  { %751 = vmatprep.subr.bf16.mxu1 %v2924_v24 }
  0x2b   :  { %723 = vmatpush1.bf16.msra.mxu0 %v2931_v25 }
  0x2c   :  { %859 = vmatprep.subr.bf16.mxu0 %v2818_v7 }
  0x2e   :  { %741 = vmatmul.mubr.bf16.vlgmr.msra.gmra.mrb[8].mxu0 %v2741_v1  ;;  %2186 = vmatmul.mubr.msk.bf16.vlgmr.msra.gmra.mrb[20].mxu1 %vm92_vm0, %v2429_v8 }
  0x2f   :  { %752 = vmatpush1.bf16.msra.mxu1 %v2940_v26  ;;  %783 = vmatprep.mubr.bf16.mxu1 %v2741_v1 }
  0x30   :  { %753 = vmatprep.subr.bf16.mxu1 %v2945_v27  ;;  %860 = vmatpush1.bf16.msra.mxu0 %v2831_v9 }
  0x31   :  { %861 = vmatprep.subr.bf16.mxu0 %v2836_v10  ;;  %891 = vmatprep.mubr.bf16.mxu0 %v2741_v1 }
  0x33   :  { %754 = vmatpush1.bf16.msra.mxu1 %v2954_v28 }
  0x34   :  { %755 = vmatprep.subr.bf16.mxu1 %v2961_v29  ;;  %862 = vmatpush1.bf16.msra.mxu0 %v2844_v11 }
  0x35   :  { %863 = vmatprep.subr.bf16.mxu0 %v2851_v12 }
  0x37   :  { %756 = vmatpush1.bf16.msra.mxu1 %v2970_v30 }
  0x38   :  { %757 = vmatprep.subr.bf16.mxu1 %v2976_v31  ;;  %864 = vmatpush1.bf16.msra.mxu0 %v2861_v14 }
  0x39   :  { %865 = vmatprep.subr.bf16.mxu0 %v2867_v15 }
  0x3b   :  { %758 = vmatpush1.bf16.msra.mxu1 %v2984_v32 }
  0x3c   :  { %759 = vmatprep.subr.bf16.mxu1 %v2990_v33  ;;  %866 = vmatpush1.bf16.msra.mxu0 %v2874_v16 }
  0x3d   :  { %867 = vmatprep.subr.bf16.mxu0 %v2881_v17 }
  0x3f   :  { %760 = vmatpush1.bf16.msra.mxu1 %v2998_v34 }
  0x40   :  { %761 = vmatprep.subr.bf16.mxu1 %v3004_v35  ;;  %868 = vmatpush1.bf16.msra.mxu0 %v2887_v18 }
  0x41   :  { %869 = vmatprep.subr.bf16.mxu0 %v2893_v19 }
  0x43   :  { %762 = vmatpush1.bf16.msra.mxu1 %v3012_v36 }
  0x44   :  { %763 = vmatprep.subr.bf16.mxu1 %v3018_v37  ;;  %870 = vmatpush1.bf16.msra.mxu0 %v2900_v20 }
  0x45   :  { %871 = vmatprep.subr.bf16.mxu0 %v2907_v21 }
  0x47   :  { %764 = vmatpush1.bf16.msra.mxu1 %v3026_v38 }
  0x48   :  { %765 = vmatprep.subr.bf16.mxu1 %v3032_v39  ;;  %872 = vmatpush1.bf16.msra.mxu0 %v2913_v22 }
  0x49   :  { %873 = vmatprep.subr.bf16.mxu0 %v2919_v23 }
  0x4b   :  { %766 = vmatpush1.bf16.msra.mxu1 %v3040_v40 }
  0x4c   :  { %902 = vmatprep.subr.bf16.mxu1 %v2924_v24  ;;  %874 = vmatpush1.bf16.msra.mxu0 %v2931_v25 }
  0x4d   :  { %1010 = vmatprep.subr.bf16.mxu0 %v2818_v7 }
  0x4e   :  { %784 = vmatmul.mubr.bf16.vlgmr.msra.gmra.mrb[4].mxu1 %v2741_v1 }
  0x4f   :  { %903 = vmatpush1.bf16.msra.mxu1 %v2940_v26  ;;  %934 = vmatprep.mubr.bf16.mxu1 %v2741_v1 }
  0x50   :  { %904 = vmatprep.subr.bf16.mxu1 %v2945_v27 }
  0x53   :  { %905 = vmatpush1.bf16.msra.mxu1 %v2954_v28 }
  0x54   :  { %906 = vmatprep.subr.bf16.mxu1 %v2961_v29 }
  0x57   :  { %907 = vmatpush1.bf16.msra.mxu1 %v2970_v30 }
  0x58   :  { %908 = vmatprep.subr.bf16.mxu1 %v2976_v31 }
  0x5b   :  { %909 = vmatpush1.bf16.msra.mxu1 %v2984_v32 }
  0x5c   :  { %910 = vmatprep.subr.bf16.mxu1 %v2990_v33 }
  0x5f   :  { %911 = vmatpush1.bf16.msra.mxu1 %v2998_v34 }
  0x60   :  { %912 = vmatprep.subr.bf16.mxu1 %v3004_v35 }
  0x63   :  { %913 = vmatpush1.bf16.msra.mxu1 %v3012_v36 }
  0x64   :  { %914 = vmatprep.subr.bf16.mxu1 %v3018_v37 }
  0x67   :  { %915 = vmatpush1.bf16.msra.mxu1 %v3026_v38 }
  0x68   :  { %916 = vmatprep.subr.bf16.mxu1 %v3032_v39 }
  0x6b   :  { %917 = vmatpush1.bf16.msra.mxu1 %v3040_v40 }
  0x6c   :  { %1053 = vmatprep.subr.bf16.mxu1 %v2924_v24 }
  0xd9   :  { %v130_v41 = vpop.f32.mrb[0].mxu1 }
  0xda   :  { %v132_v42 = vpop.f32.mrb[1].mxu1  ;;  %v131_v56 = vadd.f32 %v130_v41, %v3084_v54 }
  0xdb   :  { %v134_v43 = vpop.f32.mrb[2].mxu1  ;;  %v133_v57 = vadd.f32 %v132_v42, %v3088_v55  ;;  %v57_v42 = vsub.s32 2, %v3075_v50 }
  0xdc   :  { %v136_v44 = vpop.f32.mrb[3].mxu1  ;;  %v135_v59 = vadd.f32 %v134_v43, %v3084_v54 }
  0xdd   :  { %v137_v62 = vadd.f32 %v136_v44, %v3088_v55 }
  0xe9   :  { %v3067_v45 = vpop.f32.mrb[8].mxu1 }
  0xea   :  { %v3069_v46 = vpop.f32.mrb[9].mxu1 }
  0xeb   :  { %v3071_v47 = vpop.f32.mrb[10].mxu1 }
  0xec   :  { %v3073_v48 = vpop.f32.mrb[11].mxu1 }
 0x101   :  { %v742_v58 = vpop.f32.mrb[8].mxu0 }
 0x102   :  { %v794_v60 = vadd.f32 %v742_v58, %v131_v56  ;;  %v744_v61 = vpop.f32.mrb[9].mxu0 }
 0x103   :  { %v795_v63 = vadd.f32 %v744_v61, %v133_v57  ;;  %v746_v0 = vpop.f32.mrb[10].mxu0  ;;  %v3102_v61 = vrot.slane %v43_v52, %v3531_v49 }
 0x104   :  { %v798_v2 = vadd.f32 %v746_v0, %v135_v59  ;;  %v748_v3 = vpop.f32.mrb[11].mxu0  ;;  %v2219_v5 = vmul.f32 -1.442695, %v794_v60  ;;  %v3098_v59 = vrot.slane %v43_v52, %v57_v42 }
 0x105   :  { %v799_v4 = vadd.f32 %v748_v3, %v137_v62  ;;  %v2221_v6 = vmul.f32 -1.442695, %v795_v63 }
 0x106   :  { %2581 = vpow2.f32 %v2219_v5  ;;  %v2220_v13 = vmul.f32 -1.442695, %v798_v2 }
 0x107   :  { %v2222_v8 = vmul.f32 -1.442695, %v799_v4  ;;  %2583 = vpow2.f32 %v2221_v6 }
 0x109   :  { %2585 = vpow2.f32 %v2222_v8 }
 0x10a   :  { %2587 = vpow2.f32 %v2220_v13 }
 0x110   :  { %v2582_v41 = vpop.eup %2581 }
 0x111   :  { %v2584_v43 = vpop.eup %2583  ;;  %v808_v56 = vadd.f32 1.0, %v2582_v41 }
 0x112   :  { %v820_v58 = vadd.f32 1.0, %v2584_v43 }
 0x113   :  { %v2586_v44 = vpop.eup %2585  ;;  %2589 = vrcp.f32 %v808_v56 }
 0x114   :  { %v2588_v57 = vpop.eup %2587  ;;  %v821_v60 = vadd.f32 1.0, %v2586_v44  ;;  %2591 = vrcp.f32 %v820_v58 }
 0x115   :  { %v809_v62 = vadd.f32 1.0, %v2588_v57 }
 0x116   :  { %2593 = vrcp.f32 %v821_v60 }
 0x11d   :  { %v2590_v41 = vpop.eup %2589 }
 0x11e   :  { %v2592_v43 = vpop.eup %2591 }
 0x11f   :  { %v840_v58 = vmul.f32 0.0, %v2592_v43 }
 0x120   :  { %v2594_v44 = vpop.eup %2593 }
 0x121   :  { %v785_v63 = vpop.f32.mrb[4].mxu1 }
 0x122   :  { %v2359_v0 = vadd.f32 %v785_v63, %v3098_v59  ;;  %v787_v2 = vpop.f32.mrb[5].mxu1 }
 0x123   :  { %v2360_v3 = vadd.f32 %v787_v2, %v3102_v61  ;;  %v789_v4 = vpop.f32.mrb[6].mxu1  ;;  %v841_v2 = vmul.f32 0.0, %v2594_v44 }
 0x124   :  { %2595 = vtanh.f32 %v2359_v0  ;;  %v2361_v5 = vadd.f32 %v789_v4, %v3098_v59  ;;  %v791_v6 = vpop.f32.mrb[7].mxu1 }
 0x125   :  { %2597 = vrcp.f32 %v809_v62  ;;  %v2223_v8 = vmul.f32 -1.442695, %v2360_v3  ;;  %v2362_v52 = vadd.f32 %v791_v6, %v3102_v61 }
 0x126   :  { %2599 = vtanh.f32 %v2361_v5 }
 0x127   :  { %2601 = vpow2.f32 %v2223_v8  ;;  %v2224_v13 = vmul.f32 -1.442695, %v2362_v52 }
 0x129   :  { %2603 = vpow2.f32 %v2224_v13 }
 0x12e   :  { %v2596_v56 = vpop.eup %2595 }
 0x12f   :  { %v2598_v57 = vpop.eup %2597  ;;  %v842_v60 = vmul.f32 %v2596_v56, %v2590_v41 }
 0x130   :  { %v2600_v63 = vpop.eup %2599 }
 0x131   :  { %v2602_v0 = vpop.eup %2601  ;;  %v3108_v4 = vadd.f32 %v842_v60, %v840_v58  ;;  %v843_v62 = vmul.f32 %v2600_v63, %v2598_v57  ;;  %v238_v57 = vadd.f32 %v3069_v46, %v3088_v55  ;;  %v240_v63 = vadd.f32 %v3071_v47, %v3084_v54 }
 0x132   :  { %v834_v3 = vadd.f32 1.0, %v2602_v0 }
 0x133   :  { %v2604_v49 = vpop.eup %2603  ;;  %2605 = vtanh.f32 %v3108_v4  ;;  %v3111_v5 = vadd.f32 %v843_v62, %v841_v2 }
 0x134   :  { %2607 = vrcp.f32 %v834_v3  ;;  %v835_v6 = vadd.f32 1.0, %v2604_v49  ;;  %v236_v49 = vadd.f32 %v3067_v45, %v3084_v54  ;;  %v242_v3 = vadd.f32 %v3073_v48, %v3088_v55 }
 0x135   :  { %2609 = vtanh.f32 %v3111_v5 }
 0x136   :  { %2611 = vrcp.f32 %v835_v6 }
 0x13d   :  { %v2606_v8 = vpop.eup %2605 }
 0x13e   :  { %v2608_v52 = vpop.eup %2607 }
 0x13f   :  { %v2610_v13 = vpop.eup %2609  ;;  %v848_v43 = vmul.f32 %v2608_v52, %v2606_v8 }
 0x140   :  { %v2612_v41 = vpop.eup %2611 }
 0x141   :  { %v849_v44 = vmul.f32 %v2612_v41, %v2610_v13 }
 0x143   :  { %v858_v56 = vpack.c.bf16 %v849_v44, %v848_v43 }
 0x145   :  { %892 = vmatmul.mubr.bf16.vlgmr.msra.gmra.mrb[12].mxu0 %v858_v56  ;;  %935 = vmatmul.mubr.bf16.vlgmr.msra.gmra.mrb[12].mxu1 %v858_v56 }
 0x146   :  { %1011 = vmatpush1.bf16.msra.mxu0 %v2831_v9  ;;  %1054 = vmatpush1.bf16.msra.mxu1 %v2940_v26 }
 0x147   :  { %1012 = vmatprep.subr.bf16.mxu0 %v2836_v10  ;;  %1055 = vmatprep.subr.bf16.mxu1 %v2945_v27 }
 0x148   :  { %1042 = vmatprep.mubr.bf16.mxu0 %v2741_v1  ;;  %1085 = vmatprep.mubr.bf16.mxu1 %v2741_v1 }
 0x14a   :  { %1013 = vmatpush1.bf16.msra.mxu0 %v2844_v11  ;;  %1056 = vmatpush1.bf16.msra.mxu1 %v2954_v28 }
 0x14b   :  { %1014 = vmatprep.subr.bf16.mxu0 %v2851_v12  ;;  %1057 = vmatprep.subr.bf16.mxu1 %v2961_v29 }
 0x14e   :  { %1015 = vmatpush1.bf16.msra.mxu0 %v2861_v14  ;;  %1058 = vmatpush1.bf16.msra.mxu1 %v2970_v30 }
 0x14f   :  { %1016 = vmatprep.subr.bf16.mxu0 %v2867_v15  ;;  %1059 = vmatprep.subr.bf16.mxu1 %v2976_v31 }
 0x152   :  { %1017 = vmatpush1.bf16.msra.mxu0 %v2874_v16  ;;  %1060 = vmatpush1.bf16.msra.mxu1 %v2984_v32 }
 0x153   :  { %1018 = vmatprep.subr.bf16.mxu0 %v2881_v17  ;;  %1061 = vmatprep.subr.bf16.mxu1 %v2990_v33 }
 0x156   :  { %1019 = vmatpush1.bf16.msra.mxu0 %v2887_v18  ;;  %1062 = vmatpush1.bf16.msra.mxu1 %v2998_v34 }
 0x157   :  { %1020 = vmatprep.subr.bf16.mxu0 %v2893_v19  ;;  %1063 = vmatprep.subr.bf16.mxu1 %v3004_v35 }
 0x15a   :  { %1021 = vmatpush1.bf16.msra.mxu0 %v2900_v20  ;;  %1064 = vmatpush1.bf16.msra.mxu1 %v3012_v36 }
 0x15b   :  { %1022 = vmatprep.subr.bf16.mxu0 %v2907_v21  ;;  %1065 = vmatprep.subr.bf16.mxu1 %v3018_v37 }
 0x15e   :  { %1023 = vmatpush1.bf16.msra.mxu0 %v2913_v22  ;;  %1066 = vmatpush1.bf16.msra.mxu1 %v3026_v38 }
 0x15f   :  { %1024 = vmatprep.subr.bf16.mxu0 %v2919_v23  ;;  %1067 = vmatprep.subr.bf16.mxu1 %v3032_v39 }
 0x162   :  { %1025 = vmatpush1.bf16.msra.mxu0 %v2931_v25  ;;  %1068 = vmatpush1.bf16.msra.mxu1 %v3040_v40 }
 0x163   :  { %1161 = vmatprep.subr.bf16.mxu0 %v2818_v7  ;;  %1204 = vmatprep.subr.bf16.mxu1 %v2924_v24 }
 0x218   :  { %v893_v58 = vpop.f32.mrb[12].mxu0  ;;  %v936_v60 = vpop.f32.mrb[12].mxu1 }
 0x219   :  { %v945_v0 = vadd.f32 %v893_v58, %v236_v49  ;;  %v895_v2 = vpop.f32.mrb[13].mxu0  ;;  %v938_v62 = vpop.f32.mrb[13].mxu1  ;;  %v2371_v56 = vadd.f32 %v936_v60, %v3098_v59 }
 0x21a   :  { %v946_v7 = vadd.f32 %v895_v2, %v238_v57  ;;  %v897_v6 = vpop.f32.mrb[14].mxu0  ;;  %v940_v24 = vpop.f32.mrb[14].mxu1  ;;  %v2372_v47 = vadd.f32 %v938_v62, %v3102_v61 }
 0x21b   :  { %v2225_v8 = vmul.f32 -1.442695, %v945_v0  ;;  %v949_v52 = vadd.f32 %v897_v6, %v240_v63  ;;  %v899_v45 = vpop.f32.mrb[15].mxu0  ;;  %v942_v13 = vpop.f32.mrb[15].mxu1  ;;  %v2373_v57 = vadd.f32 %v940_v24, %v3098_v59 }
 0x21c   :  { %v2227_v41 = vmul.f32 -1.442695, %v946_v7  ;;  %v950_v46 = vadd.f32 %v899_v45, %v242_v3  ;;  %v2229_v48 = vmul.f32 -1.442695, %v2372_v47  ;;  %v2374_v49 = vadd.f32 %v942_v13, %v3102_v61 }
 0x21d   :  { %2613 = vpow2.f32 %v2225_v8  ;;  %v2226_v43 = vmul.f32 -1.442695, %v949_v52 }
 0x21e   :  { %2615 = vpow2.f32 %v2227_v41  ;;  %v2228_v44 = vmul.f32 -1.442695, %v950_v46  ;;  %v2230_v2 = vmul.f32 -1.442695, %v2374_v49 }
 0x21f   :  { %2617 = vpow2.f32 %v2226_v43 }
 0x220   :  { %2619 = vpow2.f32 %v2228_v44 }
 0x221   :  { %2621 = vtanh.f32 %v2371_v56 }
 0x222   :  { %2623 = vpow2.f32 %v2229_v48 }
 0x223   :  { %2625 = vtanh.f32 %v2373_v57 }
 0x227   :  { %v2614_v58 = vpop.eup %2613 }
 0x228   :  { %v2616_v63 = vpop.eup %2615  ;;  %v959_v0 = vadd.f32 1.0, %v2614_v58 }
 0x229   :  { %v971_v3 = vadd.f32 1.0, %v2616_v63  ;;  %v2618_v7 = vpop.eup %2617 }
 0x22a   :  { %2627 = vrcp.f32 %v959_v0  ;;  %v960_v62 = vadd.f32 1.0, %v2618_v7  ;;  %v2620_v6 = vpop.eup %2619 }
 0x22b   :  { %2629 = vrcp.f32 %v971_v3  ;;  %v972_v60 = vadd.f32 1.0, %v2620_v6  ;;  %v2622_v8 = vpop.eup %2621 }
 0x22c   :  { %2631 = vpow2.f32 %v2230_v2  ;;  %v2624_v52 = vpop.eup %2623 }
 0x22d   :  { %2633 = vrcp.f32 %v960_v62  ;;  %v2626_v24 = vpop.eup %2625  ;;  %v985_v47 = vadd.f32 1.0, %v2624_v52 }
 0x22e   :  { %2635 = vrcp.f32 %v972_v60 }
 0x22f   :  { %2637 = vrcp.f32 %v985_v47 }
 0x234   :  { %v2628_v45 = vpop.eup %2627 }
 0x235   :  { %v2630_v13 = vpop.eup %2629  ;;  %v993_v41 = vmul.f32 %v2628_v45, %v2622_v8 }
 0x236   :  { %v2632_v46 = vpop.eup %2631  ;;  %v991_v43 = vmul.f32 %v2630_v13, %v3108_v4 }
 0x237   :  { %v2634_v44 = vpop.eup %2633  ;;  %v986_v57 = vadd.f32 1.0, %v2632_v46 }
 0x238   :  { %v3161_v56 = vadd.f32 %v993_v41, %v991_v43  ;;  %v994_v48 = vmul.f32 %v2634_v44, %v2626_v24  ;;  %v2636_v49 = vpop.eup %2635 }
 0x239   :  { %v992_v58 = vmul.f32 %v2636_v49, %v3111_v5  ;;  %v2638_v0 = vpop.eup %2637 }
 0x23a   :  { %2639 = vtanh.f32 %v3161_v56 }
 0x23b   :  { %v3165_v63 = vadd.f32 %v994_v48, %v992_v58  ;;  %2641 = vrcp.f32 %v986_v57 }
 0x23d   :  { %2643 = vtanh.f32 %v3165_v63 }
 0x244   :  { %v2640_v2 = vpop.eup %2639 }
 0x245   :  { %v2642_v4 = vpop.eup %2641  ;;  %v999_v7 = vmul.f32 %v2640_v2, %v2638_v0 }
 0x247   :  { %v2644_v3 = vpop.eup %2643 }
 0x248   :  { %v1000_v62 = vmul.f32 %v2644_v3, %v2642_v4 }
 0x24a   :  { %v1009_v6 = vpack.c.bf16 %v1000_v62, %v999_v7 }
 0x24c   :  { %1043 = vmatmul.mubr.bf16.vlgmr.msra.gmra.mrb[0].mxu0 %v1009_v6  ;;  %1086 = vmatmul.mubr.bf16.vlgmr.msra.gmra.mrb[16].mxu1 %v1009_v6  ;;  %v2477_v6 = vld [vmem:[%s3525_s4] ss:$16 sps:$4 sm:$0xff]  }
 0x24d   :  { %1162 = vmatpush1.bf16.msra.mxu0 %v2831_v9  ;;  %1205 = vmatpush1.bf16.msra.mxu1 %v2940_v26 }
 0x24e   :  { %1163 = vmatprep.subr.bf16.mxu0 %v2836_v10  ;;  %1206 = vmatprep.subr.bf16.mxu1 %v2945_v27 }
 0x24f   :  { %1193 = vmatprep.mubr.bf16.mxu0 %v2741_v1  ;;  %1236 = vmatprep.mubr.bf16.mxu1 %v2741_v1 }
 0x251   :  { %1164 = vmatpush1.bf16.msra.mxu0 %v2844_v11  ;;  %1207 = vmatpush1.bf16.msra.mxu1 %v2954_v28 }
 0x252   :  { %1165 = vmatprep.subr.bf16.mxu0 %v2851_v12  ;;  %1208 = vmatprep.subr.bf16.mxu1 %v2961_v29 }
 0x255   :  { %1166 = vmatpush1.bf16.msra.mxu0 %v2861_v14  ;;  %1209 = vmatpush1.bf16.msra.mxu1 %v2970_v30 }
 0x256   :  { %1167 = vmatprep.subr.bf16.mxu0 %v2867_v15  ;;  %1210 = vmatprep.subr.bf16.mxu1 %v2976_v31 }
 0x259   :  { %1168 = vmatpush1.bf16.msra.mxu0 %v2874_v16  ;;  %1211 = vmatpush1.bf16.msra.mxu1 %v2984_v32 }
 0x25a   :  { %1169 = vmatprep.subr.bf16.mxu0 %v2881_v17  ;;  %1212 = vmatprep.subr.bf16.mxu1 %v2990_v33 }
 0x25d   :  { %1170 = vmatpush1.bf16.msra.mxu0 %v2887_v18  ;;  %1213 = vmatpush1.bf16.msra.mxu1 %v2998_v34 }
 0x25e   :  { %1171 = vmatprep.subr.bf16.mxu0 %v2893_v19  ;;  %1214 = vmatprep.subr.bf16.mxu1 %v3004_v35 }
 0x261   :  { %1172 = vmatpush1.bf16.msra.mxu0 %v2900_v20  ;;  %1215 = vmatpush1.bf16.msra.mxu1 %v3012_v36 }
 0x262   :  { %1173 = vmatprep.subr.bf16.mxu0 %v2907_v21  ;;  %1216 = vmatprep.subr.bf16.mxu1 %v3018_v37 }
 0x265   :  { %1174 = vmatpush1.bf16.msra.mxu0 %v2913_v22  ;;  %1217 = vmatpush1.bf16.msra.mxu1 %v3026_v38 }
 0x266   :  { %1175 = vmatprep.subr.bf16.mxu0 %v2919_v23  ;;  %1218 = vmatprep.subr.bf16.mxu1 %v3032_v39 }
 0x269   :  { %1176 = vmatpush1.bf16.msra.mxu0 %v2931_v25  ;;  %1219 = vmatpush1.bf16.msra.mxu1 %v3040_v40 }
 0x31f   :  { %v1044_v9 = vpop.f32.mrb[0].mxu0  ;;  %v1087_v10 = vpop.f32.mrb[16].mxu1 }
 0x320   :  { %v2375_v11 = vadd.f32 %v1044_v9, %v3084_v54  ;;  %v1046_v12 = vpop.f32.mrb[1].mxu0  ;;  %v1089_v14 = vpop.f32.mrb[17].mxu1  ;;  %v2379_v28 = vadd.f32 %v1087_v10, %v3098_v59  ;;  %v2480_v9 = vld [vmem:[%s3525_s4 + $0x8] ss:$16 sps:$4 sm:$0xff]   ;;  %v2482_v10 = vld [vmem:[%s3525_s4 + $0xc] ss:$16 sps:$4 sm:$0xff]  }
 0x321   :  { %v2376_v15 = vadd.f32 %v1046_v12, %v3088_v55  ;;  %v1048_v16 = vpop.f32.mrb[2].mxu0  ;;  %v1091_v17 = vpop.f32.mrb[18].mxu1  ;;  %v2380_v27 = vadd.f32 %v1089_v14, %v3102_v61  ;;  %1561 = vmatprep.subr.bf16.mxu1 %v2482_v10  ;;  %v2488_v12 = vld [vmem:[%s3525_s4 + $0x2c] ss:$16 sps:$4 sm:$0xff]   ;;  %v2483_v14 = vld [vmem:[%s3525_s4 + $0x20] ss:$16 sps:$4 sm:$0xff]  }
 0x322   :  { %v2231_v18 = vmul.f32 -1.442695, %v2375_v11  ;;  %v2377_v19 = vadd.f32 %v1048_v16, %v3084_v54  ;;  %v1050_v20 = vpop.f32.mrb[3].mxu0  ;;  %v1093_v21 = vpop.f32.mrb[19].mxu1  ;;  %v2381_v31 = vadd.f32 %v1091_v17, %v3098_v59  ;;  %v2485_v11 = vld [vmem:[%s3525_s4 + $0x24] ss:$16 sps:$4 sm:$0xff]  }
 0x323   :  { %v2233_v22 = vmul.f32 -1.442695, %v2376_v15  ;;  %v2378_v23 = vadd.f32 %v1050_v20, %v3088_v55  ;;  %v2235_v29 = vmul.f32 -1.442695, %v2380_v27  ;;  %v2382_v30 = vadd.f32 %v1093_v21, %v3102_v61  ;;  %v2486_v15 = vld [vmem:[%s3525_s4 + $0x28] ss:$16 sps:$4 sm:$0xff]  }
 0x324   :  { %2645 = vpow2.f32 %v2231_v18  ;;  %v2232_v25 = vmul.f32 -1.442695, %v2377_v19  ;;  %v2491_v16 = vld [vmem:[%s3525_s4 + $0x44] ss:$16 sps:$4 sm:$0xff]   ;;  %v2494_v17 = vld [vmem:[%s3525_s4 + $0x4c] ss:$16 sps:$4 sm:$0xff]  }
 0x325   :  { %2647 = vpow2.f32 %v2233_v22  ;;  %v2234_v26 = vmul.f32 -1.442695, %v2378_v23  ;;  %v2236_v35 = vmul.f32 -1.442695, %v2382_v30  ;;  %v2489_v18 = vld [vmem:[%s3525_s4 + $0x40] ss:$16 sps:$4 sm:$0xff]  }
 0x326   :  { %2649 = vpow2.f32 %v2232_v25  ;;  %v2492_v19 = vld [vmem:[%s3525_s4 + $0x48] ss:$16 sps:$4 sm:$0xff]   ;;  %v2497_v20 = vld [vmem:[%s3525_s4 + $0x64] ss:$16 sps:$4 sm:$0xff]   ;;  %v2500_v21 = vld [vmem:[%s3525_s4 + $0x6c] ss:$16 sps:$4 sm:$0xff]  }
 0x327   :  { %2651 = vpow2.f32 %v2234_v26  ;;  %v2495_v22 = vld [vmem:[%s3525_s4 + $0x60] ss:$16 sps:$4 sm:$0xff]   ;;  %v2498_v23 = vld [vmem:[%s3525_s4 + $0x68] ss:$16 sps:$4 sm:$0xff]   ;;  %v2503_v25 = vld [vmem:[%s3525_s4 + $0x84] ss:$16 sps:$4 sm:$0xff]  }
 0x328   :  { %2653 = vtanh.f32 %v2379_v28  ;;  %v2506_v26 = vld [vmem:[%s3525_s4 + $0x8c] ss:$16 sps:$4 sm:$0xff]   ;;  %v2501_v27 = vld [vmem:[%s3525_s4 + $0x80] ss:$16 sps:$4 sm:$0xff]   ;;  %v2504_v28 = vld [vmem:[%s3525_s4 + $0x88] ss:$16 sps:$4 sm:$0xff]  }
 0x329   :  { %2655 = vpow2.f32 %v2235_v29  ;;  %v2509_v29 = vld [vmem:[%s3525_s4 + $0xa4] ss:$16 sps:$4 sm:$0xff]   ;;  %v2507_v30 = vld [vmem:[%s3525_s4 + $0xa0] ss:$16 sps:$4 sm:$0xff]  }
 0x32a   :  { %2657 = vtanh.f32 %v2381_v31  ;;  %v2512_v31 = vld [vmem:[%s3525_s4 + $0xac] ss:$16 sps:$4 sm:$0xff]  }
 0x32e   :  { %v2646_v32 = vpop.eup %2645 }
 0x32f   :  { %v2648_v33 = vpop.eup %2647  ;;  %v1110_v34 = vadd.f32 1.0, %v2646_v32  ;;  %v2515_v32 = vld [vmem:[%s3525_s4 + $0xc4] ss:$16 sps:$4 sm:$0xff]  }
 0x330   :  { %v1122_v36 = vadd.f32 1.0, %v2648_v33  ;;  %v2650_v37 = vpop.eup %2649  ;;  %v2510_v33 = vld [vmem:[%s3525_s4 + $0xa8] ss:$16 sps:$4 sm:$0xff]  }
 0x331   :  { %2659 = vrcp.f32 %v1110_v34  ;;  %v1111_v38 = vadd.f32 1.0, %v2650_v37  ;;  %v2652_v39 = vpop.eup %2651  ;;  %v2513_v34 = vld [vmem:[%s3525_s4 + $0xc0] ss:$16 sps:$4 sm:$0xff]   ;;  %v2521_v37 = vld [vmem:[%s3525_s4 + $0xe4] ss:$16 sps:$4 sm:$0xff]  }
 0x332   :  { %2661 = vrcp.f32 %v1122_v36  ;;  %v1123_v40 = vadd.f32 1.0, %v2652_v39  ;;  %v2654_v5 = vpop.eup %2653  ;;  %v2516_v36 = vld [vmem:[%s3525_s4 + $0xc8] ss:$16 sps:$4 sm:$0xff]   ;;  %v2519_v39 = vld [vmem:[%s3525_s4 + $0xe0] ss:$16 sps:$4 sm:$0xff]  }
 0x333   :  { %2663 = vpow2.f32 %v2236_v35  ;;  %v2656_v60 = vpop.eup %2655  ;;  %v2518_v35 = vld [vmem:[%s3525_s4 + $0xcc] ss:$16 sps:$4 sm:$0xff]  }
 0x334   :  { %2665 = vrcp.f32 %v1111_v38  ;;  %v2658_v8 = vpop.eup %2657  ;;  %v1136_v43 = vadd.f32 1.0, %v2656_v60  ;;  %v2524_v38 = vld [vmem:[%s3525_s4 + $0xec] ss:$16 sps:$4 sm:$0xff]  }
 0x335   :  { %2667 = vrcp.f32 %v1123_v40  ;;  %v3314_v40 = vld [vmem:[%s3526_s5 + $0x4] ss:$16 sps:$4 sm:$0xff]   ;;  %v3322_v60 = vld [vmem:[%s3526_s5 + $0xc] ss:$16 sps:$4 sm:$0xff]  }
 0x336   :  { %2669 = vrcp.f32 %v1136_v43 }
 0x33b   :  { %v2660_v52 = vpop.eup %2659 }
 0x33c   :  { %v2662_v24 = vpop.eup %2661  ;;  %v1144_v45 = vmul.f32 %v2660_v52, %v2654_v5  ;;  %v2522_v5 = vld [vmem:[%s3525_s4 + $0xe8] ss:$16 sps:$4 sm:$0xff]  }
 0x33d   :  { %v2664_v13 = vpop.eup %2663  ;;  %v1142_v41 = vmul.f32 %v2662_v24, %v3161_v56 }
 0x33e   :  { %v2666_v46 = vpop.eup %2665  ;;  %v1137_v49 = vadd.f32 1.0, %v2664_v13 }
 0x33f   :  { %v3209_v44 = vadd.f32 %v1144_v45, %v1142_v41  ;;  %v1145_v47 = vmul.f32 %v2666_v46, %v2658_v8  ;;  %v2668_v48 = vpop.eup %2667 }
 0x340   :  { %v1143_v57 = vmul.f32 %v2668_v48, %v3165_v63  ;;  %v2670_v0 = vpop.eup %2669  ;;  %v2479_v63 = vld [vmem:[%s3525_s4 + $0x4] ss:$16 sps:$4 sm:$0xff]  }
 0x341   :  { %2671 = vtanh.f32 %v3209_v44  ;;  %1518 = vmatprep.subr.bf16.mxu0 %v2479_v63 }
 0x342   :  { %v3213_v58 = vadd.f32 %v1145_v47, %v1143_v57  ;;  %2673 = vrcp.f32 %v1137_v49 }
 0x344   :  { %2675 = vtanh.f32 %v3213_v58 }
 0x34b   :  { %v2672_v2 = vpop.eup %2671 }
 0x34c   :  { %v2674_v56 = vpop.eup %2673  ;;  %v1150_v3 = vmul.f32 %v2672_v2, %v2670_v0 }
 0x34e   :  { %v2676_v4 = vpop.eup %2675 }
 0x34f   :  { %v1151_v7 = vmul.f32 %v2676_v4, %v2674_v56 }
 0x351   :  { %v1160_v62 = vpack.c.bf16 %v1151_v7, %v1150_v3 }
 0x353   :  { %1194 = vmatmul.mubr.bf16.vlgmr.msra.gmra.mrb[4].mxu0 %v1160_v62  ;;  %1237 = vmatmul.mubr.bf16.vlgmr.msra.gmra.mrb[20].mxu1 %v1160_v62 }
 0x354   :  { %1550 = vmatprep.mubr.bf16.mxu0 %v2741_v1  ;;  %1593 = vmatprep.mubr.bf16.mxu1 %v2741_v1 }
 0x355   :  { %1519 = vmatpush1.bf16.msra.mxu0 %v2477_v6  ;;  %1562 = vmatpush1.bf16.msra.mxu1 %v2480_v9 }
 0x356   :  { %1520 = vmatprep.subr.bf16.mxu0 %v2485_v11  ;;  %1563 = vmatprep.subr.bf16.mxu1 %v2488_v12 }
 0x359   :  { %1521 = vmatpush1.bf16.msra.mxu0 %v2483_v14  ;;  %1564 = vmatpush1.bf16.msra.mxu1 %v2486_v15 }
 0x35a   :  { %1522 = vmatprep.subr.bf16.mxu0 %v2491_v16  ;;  %1565 = vmatprep.subr.bf16.mxu1 %v2494_v17 }
 0x35d   :  { %1523 = vmatpush1.bf16.msra.mxu0 %v2489_v18  ;;  %1566 = vmatpush1.bf16.msra.mxu1 %v2492_v19 }
 0x35e   :  { %1524 = vmatprep.subr.bf16.mxu0 %v2497_v20  ;;  %1567 = vmatprep.subr.bf16.mxu1 %v2500_v21 }
 0x361   :  { %1525 = vmatpush1.bf16.msra.mxu0 %v2495_v22  ;;  %1568 = vmatpush1.bf16.msra.mxu1 %v2498_v23 }
 0x362   :  { %1526 = vmatprep.subr.bf16.mxu0 %v2503_v25  ;;  %1569 = vmatprep.subr.bf16.mxu1 %v2506_v26 }
 0x365   :  { %1527 = vmatpush1.bf16.msra.mxu0 %v2501_v27  ;;  %1570 = vmatpush1.bf16.msra.mxu1 %v2504_v28 }
 0x366   :  { %1528 = vmatprep.subr.bf16.mxu0 %v2509_v29  ;;  %1571 = vmatprep.subr.bf16.mxu1 %v2512_v31 }
 0x369   :  { %1529 = vmatpush1.bf16.msra.mxu0 %v2507_v30  ;;  %1572 = vmatpush1.bf16.msra.mxu1 %v2510_v33 }
 0x36a   :  { %1530 = vmatprep.subr.bf16.mxu0 %v2515_v32  ;;  %1573 = vmatprep.subr.bf16.mxu1 %v2518_v35 }
 0x36d   :  { %1531 = vmatpush1.bf16.msra.mxu0 %v2513_v34  ;;  %1574 = vmatpush1.bf16.msra.mxu1 %v2516_v36 }
 0x36e   :  { %1532 = vmatprep.subr.bf16.mxu0 %v2521_v37  ;;  %1575 = vmatprep.subr.bf16.mxu1 %v2524_v38  ;;  %v3344_v38 = vld [vmem:[%s3526_s5 + $0x8] ss:$16 sps:$4 sm:$0xff]  }
 0x371   :  { %1533 = vmatpush1.bf16.msra.mxu0 %v2519_v39  ;;  %1576 = vmatpush1.bf16.msra.mxu1 %v2522_v5  ;;  %v3349_v39 = vld [vmem:[%s3526_s5 + $0x24] ss:$16 sps:$4 sm:$0xff]   ;;  %v3354_v5 = vld [vmem:[%s3526_s5 + $0x2c] ss:$16 sps:$4 sm:$0xff]  }
 0x372   :  { %1814 = vmatprep.subr.bf16.mxu0 %v3314_v40  ;;  %1855 = vmatprep.subr.bf16.mxu1 %v3322_v60 }
 0x426   :  { %v1195_v8 = vpop.f32.mrb[4].mxu0  ;;  %v1238_v52 = vpop.f32.mrb[20].mxu1 }
 0x427   :  { %v2383_v24 = vadd.f32 %v1195_v8, %v3084_v54  ;;  %v1197_v45 = vpop.f32.mrb[5].mxu0  ;;  %v1240_v13 = vpop.f32.mrb[21].mxu1  ;;  %v2387_v7 = vadd.f32 %v1238_v52, %v3098_v59  ;;  %v3361_v8 = vld [vmem:[%s3526_s5 + $0x20] ss:$16 sps:$4 sm:$0xff]   ;;  %v3366_v52 = vld [vmem:[%s3526_s5 + $0x28] ss:$16 sps:$4 sm:$0xff]  }
 0x428   :  { %v2384_v41 = vadd.f32 %v1197_v45, %v3088_v55  ;;  %v1199_v46 = vpop.f32.mrb[6].mxu0  ;;  %v1242_v43 = vpop.f32.mrb[22].mxu1  ;;  %v2388_v3 = vadd.f32 %v1240_v13, %v3102_v61  ;;  %v3378_v45 = vld [vmem:[%s3526_s5 + $0x4c] ss:$16 sps:$4 sm:$0xff]   ;;  %v2537_v13 = vld [vmem:[%s3526_s5 + $0x40] ss:$16 sps:$4 sm:$0xff]  }
 0x429   :  { %v2237_v47 = vmul.f32 -1.442695, %v2383_v24  ;;  %v2385_v48 = vadd.f32 %v1199_v46, %v3084_v54  ;;  %v1201_v49 = vpop.f32.mrb[7].mxu0  ;;  %v1244_v57 = vpop.f32.mrb[23].mxu1  ;;  %v2389_v54 = vadd.f32 %v1242_v43, %v3098_v59  ;;  %v3373_v24 = vld [vmem:[%s3526_s5 + $0x44] ss:$16 sps:$4 sm:$0xff]  }
 0x42a   :  { %v2239_v0 = vmul.f32 -1.442695, %v2384_v41  ;;  %v2386_v2 = vadd.f32 %v1201_v49, %v3088_v55  ;;  %v2241_v62 = vmul.f32 -1.442695, %v2388_v3  ;;  %v2390_v63 = vadd.f32 %v1244_v57, %v3102_v61  ;;  %v2540_v41 = vld [vmem:[%s3526_s5 + $0x48] ss:$16 sps:$4 sm:$0xff]  }
 0x42b   :  { %2677 = vpow2.f32 %v2237_v47  ;;  %v2238_v56 = vmul.f32 -1.442695, %v2385_v48  ;;  %v2545_v46 = vld [vmem:[%s3526_s5 + $0x64] ss:$16 sps:$4 sm:$0xff]   ;;  %v2548_v43 = vld [vmem:[%s3526_s5 + $0x6c] ss:$16 sps:$4 sm:$0xff]  }
 0x42c   :  { %2679 = vpow2.f32 %v2239_v0  ;;  %v2240_v4 = vmul.f32 -1.442695, %v2386_v2  ;;  %v2242_v55 = vmul.f32 -1.442695, %v2390_v63  ;;  %v2543_v47 = vld [vmem:[%s3526_s5 + $0x60] ss:$16 sps:$4 sm:$0xff]  }
 0x42d   :  { %2681 = vpow2.f32 %v2238_v56  ;;  %v2546_v48 = vld [vmem:[%s3526_s5 + $0x68] ss:$16 sps:$4 sm:$0xff]   ;;  %v2551_v49 = vld [vmem:[%s3526_s5 + $0x84] ss:$16 sps:$4 sm:$0xff]   ;;  %v2554_v57 = vld [vmem:[%s3526_s5 + $0x8c] ss:$16 sps:$4 sm:$0xff]  }
 0x42e   :  { %2683 = vpow2.f32 %v2240_v4  ;;  %v2549_v0 = vld [vmem:[%s3526_s5 + $0x80] ss:$16 sps:$4 sm:$0xff]   ;;  %v2552_v2 = vld [vmem:[%s3526_s5 + $0x88] ss:$16 sps:$4 sm:$0xff]   ;;  %v2557_v56 = vld [vmem:[%s3526_s5 + $0xa4] ss:$16 sps:$4 sm:$0xff]  }
 0x42f   :  { %2685 = vtanh.f32 %v2387_v7  ;;  %v2560_v4 = vld [vmem:[%s3526_s5 + $0xac] ss:$16 sps:$4 sm:$0xff]   ;;  %v2555_v3 = vld [vmem:[%s3526_s5 + $0xa0] ss:$16 sps:$4 sm:$0xff]   ;;  %v2558_v7 = vld [vmem:[%s3526_s5 + $0xa8] ss:$16 sps:$4 sm:$0xff]  }
 0x430   :  { %2687 = vpow2.f32 %v2241_v62  ;;  %v2563_v62 = vld [vmem:[%s3526_s5 + $0xc4] ss:$16 sps:$4 sm:$0xff]   ;;  %v2566_v63 = vld [vmem:[%s3526_s5 + $0xcc] ss:$16 sps:$4 sm:$0xff]  }
 0x431   :  { %2689 = vtanh.f32 %v2389_v54  ;;  %v2561_v54 = vld [vmem:[%s3526_s5 + $0xc0] ss:$16 sps:$4 sm:$0xff]  }
 0x435   :  { %v2678_v6 = vpop.eup %2677 }
 0x436   :  { %v2680_v9 = vpop.eup %2679  ;;  %v1261_v10 = vadd.f32 1.0, %v2678_v6  ;;  %v2564_v6 = vld [vmem:[%s3526_s5 + $0xc8] ss:$16 sps:$4 sm:$0xff]  }
 0x437   :  { %v1273_v11 = vadd.f32 1.0, %v2680_v9  ;;  %v2682_v12 = vpop.eup %2681  ;;  %v2569_v9 = vld [vmem:[%s3526_s5 + $0xe4] ss:$16 sps:$4 sm:$0xff]  }
 0x438   :  { %2691 = vrcp.f32 %v1261_v10  ;;  %v1262_v14 = vadd.f32 1.0, %v2682_v12  ;;  %v2684_v15 = vpop.eup %2683  ;;  %v2572_v10 = vld [vmem:[%s3526_s5 + $0xec] ss:$16 sps:$4 sm:$0xff]   ;;  %v2742_v12 = vmov 0.0|0.0  }
 0x439   :  { %2693 = vrcp.f32 %v1273_v11  ;;  %v1274_v16 = vadd.f32 1.0, %v2684_v15  ;;  %v2686_v61 = vpop.eup %2685  ;;  %v2570_v11 = vld [vmem:[%s3526_s5 + $0xe8] ss:$16 sps:$4 sm:$0xff]  }
 0x43a   :  { %2695 = vpow2.f32 %v2242_v55  ;;  %v2688_v17 = vpop.eup %2687  ;;  %v2567_v55 = vld [vmem:[%s3526_s5 + $0xe0] ss:$16 sps:$4 sm:$0xff]  }
 0x43b   :  { %2697 = vrcp.f32 %v1262_v14  ;;  %v2690_v59 = vpop.eup %2689  ;;  %v1287_v21 = vadd.f32 1.0, %v2688_v17 }
 0x43c   :  { %2699 = vrcp.f32 %v1274_v16 }
 0x43d   :  { %2701 = vrcp.f32 %v1287_v21 }
 0x442   :  { %v2692_v18 = vpop.eup %2691 }
 0x443   :  { %v2694_v19 = vpop.eup %2693  ;;  %v1295_v20 = vmul.f32 %v2692_v18, %v2686_v61 }
 0x444   :  { %v2696_v22 = vpop.eup %2695  ;;  %v1293_v23 = vmul.f32 %v2694_v19, %v3209_v44  ;;  %v3339_v44 = vld [vmem:[%s3526_s5] ss:$16 sps:$4 sm:$0xff]  }
 0x445   :  { %v2698_v25 = vpop.eup %2697  ;;  %v1288_v29 = vadd.f32 1.0, %v2696_v22 }
 0x446   :  { %v1297_v26 = vadd.f32 %v1295_v20, %v1293_v23  ;;  %v1296_v27 = vmul.f32 %v2698_v25, %v2690_v59  ;;  %v2700_v28 = vpop.eup %2699  ;;  %v3532_v59 = vsub.s32 3, %v3075_v50 }
 0x447   :  { %v1294_v30 = vmul.f32 %v2700_v28, %v3213_v58  ;;  %v2702_v32 = vpop.eup %2701 }
 0x448   :  { %2703 = vtanh.f32 %v1297_v26 }
 0x449   :  { %v1298_v31 = vadd.f32 %v1296_v27, %v1294_v30  ;;  %2705 = vrcp.f32 %v1288_v29 }
 0x44b   :  { %2707 = vtanh.f32 %v1298_v31 }
 0x452   :  { %v2704_v33 = vpop.eup %2703 }
 0x453   :  { %v1301_v34 = vmul.f32 %v2704_v33, %v2702_v32  ;;  %v2706_v35 = vpop.eup %2705 }
 0x455   :  { %v2708_v36 = vpop.eup %2707 }
 0x456   :  { %v1302_v37 = vmul.f32 %v2708_v36, %v2706_v35 }
 0x458   :  { %v1303_v58 = vpack.c.bf16 %v1302_v37, %v1301_v34 }
 0x45a   :  { %1551 = vmatmul.mubr.bf16.vlgmr.msra.gmra.mrb[16].mxu0 %v1303_v58  ;;  %1594 = vmatmul.mubr.bf16.vlgmr.msra.gmra.mrb[24].mxu1 %v1303_v58 }
 0x45b   :  { %1815 = vmatpush1.bf16.msra.mxu0 %v3339_v44  ;;  %1856 = vmatpush1.bf16.msra.mxu1 %v3344_v38 }
 0x45c   :  { %1816 = vmatprep.subr.bf16.mxu0 %v3349_v39  ;;  %1857 = vmatprep.subr.bf16.mxu1 %v3354_v5 }
 0x45d   :  { %1846 = vmatprep.mubr.bf16.mxu0 %v2741_v1  ;;  %1887 = vmatprep.mubr.bf16.mxu1 %v2741_v1 }
 0x45f   :  { %1817 = vmatpush1.bf16.msra.mxu0 %v3361_v8  ;;  %1858 = vmatpush1.bf16.msra.mxu1 %v3366_v52 }
 0x460   :  { %1818 = vmatprep.subr.bf16.mxu0 %v3373_v24  ;;  %1859 = vmatprep.subr.bf16.mxu1 %v3378_v45 }
 0x463   :  { %1819 = vmatpush1.bf16.msra.mxu0 %v2537_v13  ;;  %1860 = vmatpush1.bf16.msra.mxu1 %v2540_v41 }
 0x464   :  { %1820 = vmatprep.subr.bf16.mxu0 %v2545_v46  ;;  %1861 = vmatprep.subr.bf16.mxu1 %v2548_v43 }
 0x467   :  { %1821 = vmatpush1.bf16.msra.mxu0 %v2543_v47  ;;  %1862 = vmatpush1.bf16.msra.mxu1 %v2546_v48 }
 0x468   :  { %1822 = vmatprep.subr.bf16.mxu0 %v2551_v49  ;;  %1863 = vmatprep.subr.bf16.mxu1 %v2554_v57 }
 0x46b   :  { %1823 = vmatpush1.bf16.msra.mxu0 %v2549_v0  ;;  %1864 = vmatpush1.bf16.msra.mxu1 %v2552_v2 }
 0x46c   :  { %1824 = vmatprep.subr.bf16.mxu0 %v2557_v56  ;;  %1865 = vmatprep.subr.bf16.mxu1 %v2560_v4 }
 0x46f   :  { %1825 = vmatpush1.bf16.msra.mxu0 %v2555_v3  ;;  %1866 = vmatpush1.bf16.msra.mxu1 %v2558_v7 }
 0x470   :  { %1826 = vmatprep.subr.bf16.mxu0 %v2563_v62  ;;  %1867 = vmatprep.subr.bf16.mxu1 %v2566_v63 }
 0x473   :  { %1827 = vmatpush1.bf16.msra.mxu0 %v2561_v54  ;;  %1868 = vmatpush1.bf16.msra.mxu1 %v2564_v6 }
 0x474   :  { %1828 = vmatprep.subr.bf16.mxu0 %v2569_v9  ;;  %1869 = vmatprep.subr.bf16.mxu1 %v2572_v10 }
 0x477   :  { %1829 = vmatpush1.bf16.msra.mxu0 %v2567_v55  ;;  %1870 = vmatpush1.bf16.msra.mxu1 %v2570_v11 }
 0x478   :  { %1932 = vmatprep.subr.bf16.mxu0 %v3314_v40  ;;  %1973 = vmatprep.subr.bf16.mxu1 %v3322_v60 }
 0x47a   :  { %1847 = vmatmul.mubr.bf16.vlgmr.msra.gmra.mrb[20].mxu0 %v2742_v12  ;;  %1888 = vmatmul.mubr.bf16.vlgmr.msra.gmra.mrb[28].mxu1 %v2742_v12 }
 0x47b   :  { %1933 = vmatpush1.bf16.msra.mxu0 %v3339_v44  ;;  %1974 = vmatpush1.bf16.msra.mxu1 %v3344_v38 }
 0x47c   :  { %1934 = vmatprep.subr.bf16.mxu0 %v3349_v39  ;;  %1975 = vmatprep.subr.bf16.mxu1 %v3354_v5 }
 0x47d   :  { %1964 = vmatprep.mubr.bf16.mxu0 %v2741_v1  ;;  %2005 = vmatprep.mubr.bf16.mxu1 %v2741_v1  ;;  %v1336_v1 = vld [vmem:[%s3527_s6] sm:$0xf] }
 0x47e   :  { %v1341_v14 = vrot.slane %v1336_v1, %v49_v51  ;;  %v1349_v15 = vrot.slane %v1336_v1, %v57_v42  ;;  %v1345_v17 = vrot.slane %v1336_v1, %v53_v53  ;;  %v1353_v18 = vrot.slane %v1336_v1, %v3532_v59 }
 0x47f   :  { %1935 = vmatpush1.bf16.msra.mxu0 %v3361_v8  ;;  %1976 = vmatpush1.bf16.msra.mxu1 %v3366_v52 }
 0x480   :  { %1936 = vmatprep.subr.bf16.mxu0 %v3373_v24  ;;  %1977 = vmatprep.subr.bf16.mxu1 %v3378_v45 }
 0x483   :  { %1937 = vmatpush1.bf16.msra.mxu0 %v2537_v13  ;;  %1978 = vmatpush1.bf16.msra.mxu1 %v2540_v41 }
 0x484   :  { %1938 = vmatprep.subr.bf16.mxu0 %v2545_v46  ;;  %1979 = vmatprep.subr.bf16.mxu1 %v2548_v43 }
 0x487   :  { %1939 = vmatpush1.bf16.msra.mxu0 %v2543_v47  ;;  %1980 = vmatpush1.bf16.msra.mxu1 %v2546_v48 }
 0x488   :  { %1940 = vmatprep.subr.bf16.mxu0 %v2551_v49  ;;  %1981 = vmatprep.subr.bf16.mxu1 %v2554_v57 }
 0x48b   :  { %1941 = vmatpush1.bf16.msra.mxu0 %v2549_v0  ;;  %1982 = vmatpush1.bf16.msra.mxu1 %v2552_v2 }
 0x48c   :  { %1942 = vmatprep.subr.bf16.mxu0 %v2557_v56  ;;  %1983 = vmatprep.subr.bf16.mxu1 %v2560_v4 }
 0x48f   :  { %1943 = vmatpush1.bf16.msra.mxu0 %v2555_v3  ;;  %1984 = vmatpush1.bf16.msra.mxu1 %v2558_v7  ;;  %v2573_v3 = vld [vmem:[%s3528_s7] sm:$0xff]   ;;  %v2743_v7 = vmov 0.0  }
 0x490   :  { %1944 = vmatprep.subr.bf16.mxu0 %v2563_v62  ;;  %1985 = vmatprep.subr.bf16.mxu1 %v2566_v63  ;;  %v2574_v62 = vld [vmem:[%s3528_s7 + $0x8] sm:$0xff]   ;;  %v2575_v63 = vld [vmem:[%s3528_s7 + $0x10] sm:$0xff]  }
 0x493   :  { %1945 = vmatpush1.bf16.msra.mxu0 %v2561_v54  ;;  %1986 = vmatpush1.bf16.msra.mxu1 %v2564_v6  ;;  %v2576_v54 = vld [vmem:[%s3528_s7 + $0x18] sm:$0xff]   ;;  %v2577_v6 = vld [vmem:[%s3528_s7 + $0x20] sm:$0xff]  }
 0x494   :  { %1946 = vmatprep.subr.bf16.mxu0 %v2569_v9  ;;  %1987 = vmatprep.subr.bf16.mxu1 %v2572_v10  ;;  %v2578_v9 = vld [vmem:[%s3528_s7 + $0x28] sm:$0xff]   ;;  %v2579_v10 = vld [vmem:[%s3528_s7 + $0x30] sm:$0xff]  }
 0x497   :  { %1947 = vmatpush1.bf16.msra.mxu0 %v2567_v55  ;;  %1988 = vmatpush1.bf16.msra.mxu1 %v2570_v11  ;;  %v2580_v55 = vld [vmem:[%s3528_s7 + $0x38] sm:$0xff]  }
 0x498   :  { %2331 = vmatprep.subr.bf16.mxu0 %v2743_v7 }
 0x52d   :  { %v1552_v40 = vpop.f32.mrb[16].mxu0  ;;  %v1595_v60 = vpop.f32.mrb[24].mxu1 }
 0x52e   :  { %v1554_v16 = vpop.f32.mrb[17].mxu0  ;;  %v1597_v61 = vpop.f32.mrb[25].mxu1  ;;  %v1553_v42 = vadd.f32 %v1552_v40, %v1341_v14  ;;  %v1596_v27 = vadd.f32 %v1595_v60, %v1349_v15 }
 0x52f   :  { %v1556_v19 = vpop.f32.mrb[18].mxu0  ;;  %v1599_v20 = vpop.f32.mrb[26].mxu1  ;;  %v1555_v28 = vadd.f32 %v1554_v16, %v1345_v17  ;;  %v1598_v29 = vadd.f32 %v1597_v61, %v1353_v18 }
 0x530   :  { %v3475_v21 = vadd.f32 %v1556_v19, %v1341_v14  ;;  %v3477_v22 = vadd.f32 %v1599_v20, %v1349_v15  ;;  %v1558_v23 = vpop.f32.mrb[19].mxu0  ;;  %v1601_v25 = vpop.f32.mrb[27].mxu1 }
 0x531   :  { %v3479_v51 = vadd.f32 %v1558_v23, %v1345_v17  ;;  %v3481_v26 = vadd.f32 %v1601_v25, %v1353_v18 }
 0x54d   :  { %v1848_v53 = vpop.f32.mrb[20].mxu0  ;;  %v1889_v30 = vpop.f32.mrb[28].mxu1 }
 0x54e   :  { %v1896_v50 = vadd.f32 %v1848_v53, %v1553_v42  ;;  %v1898_v31 = vadd.f32 %v1889_v30, %v1596_v27  ;;  %v1850_v32 = vpop.f32.mrb[21].mxu0  ;;  %v1891_v33 = vpop.f32.mrb[29].mxu1 }
 0x54f   :  { %v1897_v34 = vadd.f32 %v1850_v32, %v1555_v28  ;;  %v1899_v35 = vadd.f32 %v1891_v33, %v1598_v29  ;;  %v1852_v36 = vpop.f32.mrb[22].mxu0  ;;  %v1893_v37 = vpop.f32.mrb[30].mxu1 }
 0x550   :  { %v2307_v44 = vmul.f32 -1.442695, %v1896_v50  ;;  %v1853_v38 = vpop.f32.mrb[23].mxu0  ;;  %v1894_v58 = vpop.f32.mrb[31].mxu1 }
 0x551   :  { %v2308_v39 = vmul.f32 -1.442695, %v1897_v34  ;;  %v2309_v5 = vmul.f32 -1.442695, %v1899_v35  ;;  %v2313_v35 = vld [vmem:[%s3529_s8] ss:$0 sm:$0xff] }
 0x552   :  { %2709 = vpow2.f32 %v2307_v44 }
 0x553   :  { %2711 = vpow2.f32 %v2308_v39 }
 0x554   :  { %2713 = vpow2.f32 %v2309_v5 }
 0x555   :  { %2715 = vtanh.f32 %v1898_v31 }
 0x55c   :  { %v2710_v8 = vpop.eup %2709 }
 0x55d   :  { %v2712_v52 = vpop.eup %2711  ;;  %v1903_v24 = vadd.f32 1.0, %v2710_v8 }
 0x55e   :  { %v1909_v45 = vadd.f32 1.0, %v2712_v52  ;;  %v2714_v13 = vpop.eup %2713 }
 0x55f   :  { %2717 = vrcp.f32 %v1903_v24  ;;  %v2716_v41 = vpop.eup %2715  ;;  %v1916_v48 = vadd.f32 1.0, %v2714_v13 }
 0x560   :  { %2719 = vrcp.f32 %v1909_v45 }
 0x561   :  { %2721 = vrcp.f32 %v1916_v48 }
 0x569   :  { %v2718_v46 = vpop.eup %2717 }
 0x56a   :  { %v2720_v43 = vpop.eup %2719  ;;  %v1920_v47 = vmul.f32 %v2718_v46, %v2716_v41 }
 0x56b   :  { %v1919_v49 = vmul.f32 0.0, %v2720_v43  ;;  %v2722_v0 = vpop.eup %2721 }
 0x56d   :  { %v3483_v57 = vadd.f32 %v1920_v47, %v1919_v49 }
 0x56f   :  { %2723 = vtanh.f32 %v3483_v57 }
 0x579   :  { %v2724_v2 = vpop.eup %2723 }
 0x57a   :  { %v1923_v56 = vmul.f32 %v2724_v2, %v2722_v0 }
 0x57c   :  { %v1931_v4 = vpack.c.bf16 %v1923_v56, %v1923_v56 }
 0x57e   :  { %1965 = vmatmul.mubr.bf16.vlgmr.msra.gmra.mrb[24].mxu0 %v1931_v4  ;;  %2006 = vmatmul.mubr.bf16.vlgmr.msra.gmra.mrb[32].mxu1 %v1931_v4 }
 0x57f   :  { %2332 = vmatpush3.bf16.msra.mxu0 %v2573_v3  ;;  %2347 = vmatprep.mubr.msk.bf16.mxu0 %vm2744_vm1, %v2743_v7 }
 0x580   :  { %2333 = vmatprep.subr.bf16.mxu0 %v2743_v7 }
 0x583   :  { %2334 = vmatpush3.bf16.msra.mxu0 %v2574_v62 }
 0x584   :  { %2335 = vmatprep.subr.bf16.mxu0 %v2743_v7 }
 0x587   :  { %2336 = vmatpush3.bf16.msra.mxu0 %v2575_v63 }
 0x588   :  { %2337 = vmatprep.subr.bf16.mxu0 %v2743_v7 }
 0x58b   :  { %2338 = vmatpush3.bf16.msra.mxu0 %v2576_v54 }
 0x58c   :  { %2339 = vmatprep.subr.bf16.mxu0 %v2743_v7 }
 0x58f   :  { %2340 = vmatpush3.bf16.msra.mxu0 %v2577_v6 }
 0x590   :  { %2341 = vmatprep.subr.bf16.mxu0 %v2743_v7 }
 0x593   :  { %2342 = vmatpush3.bf16.msra.mxu0 %v2578_v9 }
 0x594   :  { %2343 = vmatprep.subr.bf16.mxu0 %v2743_v7 }
 0x597   :  { %2344 = vmatpush3.bf16.msra.mxu0 %v2579_v10 }
 0x598   :  { %2345 = vmatprep.subr.bf16.mxu0 %v2743_v7 }
 0x59b   :  { %2346 = vmatpush3.bf16.msra.mxu0 %v2580_v55 }
 0x651   :  { %v1966_v11 = vpop.f32.mrb[24].mxu0  ;;  %v2007_v12 = vpop.f32.mrb[32].mxu1 }
 0x652   :  { %v2014_v1 = vadd.f32 %v1966_v11, %v3475_v21  ;;  %v2016_v40 = vadd.f32 %v2007_v12, %v3477_v22  ;;  %v1968_v60 = vpop.f32.mrb[25].mxu0  ;;  %v2009_v14 = vpop.f32.mrb[33].mxu1 }
 0x653   :  { %v2015_v15 = vadd.f32 %v1968_v60, %v3479_v51  ;;  %v2017_v16 = vadd.f32 %v2009_v14, %v3481_v26  ;;  %v1970_v61 = vpop.f32.mrb[26].mxu0  ;;  %v2011_v17 = vpop.f32.mrb[34].mxu1 }
 0x654   :  { %v2310_v59 = vmul.f32 -1.442695, %v2014_v1  ;;  %v1971_v18 = vpop.f32.mrb[27].mxu0  ;;  %v2012_v19 = vpop.f32.mrb[35].mxu1 }
 0x655   :  { %v2311_v20 = vmul.f32 -1.442695, %v2015_v15  ;;  %v2312_v23 = vmul.f32 -1.442695, %v2017_v16 }
 0x656   :  { %2725 = vpow2.f32 %v2310_v59 }
 0x657   :  { %2727 = vpow2.f32 %v2311_v20 }
 0x658   :  { %2729 = vpow2.f32 %v2312_v23 }
 0x659   :  { %2731 = vtanh.f32 %v2016_v40 }
 0x660   :  { %v2726_v25 = vpop.eup %2725 }
 0x661   :  { %v2728_v42 = vpop.eup %2727  ;;  %v2021_v21 = vadd.f32 1.0, %v2726_v25 }
 0x662   :  { %v2027_v22 = vadd.f32 1.0, %v2728_v42  ;;  %v2730_v51 = vpop.eup %2729 }
 0x663   :  { %2733 = vrcp.f32 %v2021_v21  ;;  %v2732_v27 = vpop.eup %2731  ;;  %v2034_v53 = vadd.f32 1.0, %v2730_v51 }
 0x664   :  { %2735 = vrcp.f32 %v2027_v22 }
 0x665   :  { %2737 = vrcp.f32 %v2034_v53 }
 0x66d   :  { %v2734_v26 = vpop.eup %2733 }
 0x66e   :  { %v2736_v28 = vpop.eup %2735  ;;  %v2038_v29 = vmul.f32 %v2734_v26, %v2732_v27 }
 0x66f   :  { %v2037_v30 = vmul.f32 %v2736_v28, %v3483_v57  ;;  %v2738_v31 = vpop.eup %2737 }
 0x671   :  { %v2039_v50 = vadd.f32 %v2038_v29, %v2037_v30 }
 0x673   :  { %2739 = vtanh.f32 %v2039_v50 }
 0x67d   :  { %v2740_v32 = vpop.eup %2739 }
 0x67e   :  { %v2041_v33 = vmul.f32 %v2740_v32, %v2738_v31 }
 0x680   :  { %v2047_v34 = vpack.c.bf16 %v2041_v33, %v2041_v33 }
 0x682   :  { %2348 = vmatmul.mubr.bf16.vlgmr.msra.gmra.mrb[28].mxu0 %v2047_v34 }
 0x755   :  { %v2153_v36 = vpop.f32.mrb[28].mxu0 }
 0x756   :  { %v2154_v37 = vadd.f32 %v2313_v35, %v2153_v36  ;;  %v2349_v44 = vpop.f32.mrb[29].mxu0 }
 0x757   :  { %v2156_v38 = vpop.f32.mrb[30].mxu0 }
 0x758   :  { %2159 = vst [vmem:[%s3530_s9] sm:$0xff] %v2154_v37  ;;  %v2350_v58 = vpop.f32.mrb[31].mxu0 }

</bundles_post_ra>
